<compile_context>
chip_gen: v5e
topology: v5e:2x2
jax: 0.10.0
libtpu: 0.0.40
codegen_flags: <defaults>
</compile_context>

<pallas_src>
import math

import jax
import jax.numpy as jnp
from jax.experimental import pallas as pl
from jax.experimental.pallas import tpu as pltpu


K = 256
L = 2.0 / K
W = L / 2.5

_INV_W = 1.0 / W
_HALF_L = L / 2.0
_C = math.exp(-_HALF_L * _INV_W)      # exp(-(L/2)/W)
_INV_C = 1.0 / _C
_SCALE = _INV_C - _C                  # 1/c - c
_CLIP = 40.0                          # keeps exp(t) and exp(t)^2 finite in f32


def _round_up(n, m):
    return ((n + m - 1) // m) * m


def _make_kernel(inv_n):
    def kernel(x_ref, o_ref):
        # x_ref : (1, 1, HW_TILE)  pixels for one batch element, one HW tile
        # o_ref : (1, 1, K)        accumulator / normalized histogram row
        hw = pl.program_id(1)

        @pl.when(hw == 0)
        def _init():
            o_ref[...] = jnp.zeros_like(o_ref)

        # Bin centers mu_k = L*(k + 0.5), generated on the fly (K on the lane axis).
        k_idx = jax.lax.broadcasted_iota(jnp.int32, (1, K), 1).astype(jnp.float32)
        mu = (k_idx + 0.5) * L                           # (1, K)

        x = x_ref[0, 0, :]                               # (HW_TILE,)
        xc = x[:, None]                                  # (HW_TILE, 1) column

        d = xc - mu                                      # (HW_TILE, K), K lane-dense

        # phi = sigmoid((d+L/2)/W) - sigmoid((d-L/2)/W)
        #     = e*(1/c - c) / ((1 + e*c)*(1 + e/c)),  e = exp(-d/W), c = exp(-(L/2)/W)
        t = jnp.clip(-d * _INV_W, -_CLIP, _CLIP)
        e = jnp.exp(t)                                   # single EUP op per element
        num = e * _SCALE
        den = (1.0 + e * _C) * (1.0 + e * _INV_C)
        phi = num / den                                  # exact divide (tolerance-safe)

        # Sublane/VALU reduction -> (K,) lane-dense partial sum.
        o_ref[...] += jnp.sum(phi, axis=0)[None, None, :]

        @pl.when(hw == pl.num_programs(1) - 1)
        def _finalize():
            o_ref[...] = o_ref[...] * inv_n

    return kernel


def single_dim_hist_layer(x, *, hw_tile=2048):
    """x: (B, H, W) float32 -> (B, K) float32 normalized soft histogram."""
    B, H, Wd = x.shape
    N = H * Wd

    # Pad the flattened spatial axis to a lane-aligned multiple of the tile.
    hw_pad = _round_up(N, 128)
    tile = _round_up(min(hw_tile, hw_pad), 128)
    hw_pad = _round_up(hw_pad, tile)
    num_hw = hw_pad // tile

    x_flat = x.reshape(B, 1, N).astype(jnp.float32)
    if hw_pad != N:
        # Pad value far outside the histogram support: phi(pad) ~ exp(-40) ~ 0.
        x_flat = jnp.pad(
            x_flat, ((0, 0), (0, 0), (0, hw_pad - N)), constant_values=1e6
        )

    kernel = _make_kernel(1.0 / N)

    out = pl.pallas_call(
        kernel,
        out_shape=jax.ShapeDtypeStruct((B, 1, K), jnp.float32),
        grid_spec=pltpu.PrefetchScalarGridSpec(
            num_scalar_prefetch=0,
            grid=(B, num_hw),
            in_specs=[
                pl.BlockSpec((1, 1, tile), lambda b, h: (b, 0, h)),
            ],
            out_specs=pl.BlockSpec((1, 1, K), lambda b, h: (b, 0, 0)),
        ),
        compiler_params=pltpu.CompilerParams(
            dimension_semantics=("parallel", "arbitrary"),
            vmem_limit_bytes=32 * 1024 * 1024,
        ),
        cost_estimate=pl.CostEstimate(
            flops=8 * B * K * hw_pad,
            transcendentals=B * K * hw_pad,
            bytes_accessed=4 * (B * hw_pad + B * K),
        ),
    )(x_flat)

    return out.reshape(B, K)


def _reference(x):
    """Pure-JAX reference mirroring the PyTorch forward (two sigmoids)."""
    B = x.shape[0]
    N = x.shape[1] * x.shape[2]
    mu_k = (L * (jnp.arange(K, dtype=jnp.float32) + 0.5)).reshape(K, 1)
    xf = x.reshape(B, 1, -1).astype(jnp.float32)          # (B, 1, HW)
    d = xf - mu_k                                         # (B, K, HW)
    phi = jax.nn.sigmoid((d + L / 2) / W) - jax.nn.sigmoid((d - L / 2) / W)
    return phi.sum(axis=2) / N


if __name__ == "__main__":
    key = jax.random.PRNGKey(0)
    B, H, Wd = 2, 16, 20   # HW = 320 -> padded to 384; exercises padding path
    x = jax.random.uniform(key, (B, H, Wd), dtype=jnp.float32)

    ref = _reference(x)

    # Small tile: exercises the multi-step accumulator (3 hw steps) + padding.
    out_small = jax.block_until_ready(single_dim_hist_layer(x, hw_tile=128))
    # Default tile: single hw step for this small input.
    out_default = jax.block_until_ready(single_dim_hist_layer(x))

    for out in (out_small, out_default):
        assert out.shape == (B, K), out.shape
        err = float(jnp.max(jnp.abs(out - ref)))
        assert jnp.allclose(out, ref, atol=1e-5, rtol=1e-4), err

    print("KERNEL_OK")
</pallas_src>

<mosaic_0001>
module attributes {stable_mosaic.version = 11 : i64} {
  func.func @kernel(%arg0: i32, %arg1: i32, %arg2: memref<1x1x128xf32, #tpu.memory_space<vmem>>, %arg3: memref<1x1x256xf32, #tpu.memory_space<vmem>>) attributes {dimension_semantics = [#tpu.dimension_semantics<parallel>, #tpu.dimension_semantics<arbitrary>], iteration_bounds = array<i64: 2, 3>, scalar_prefetch = 0 : i64, scratch_operands = 0 : i64, tpu.core_type = #tpu.core_type<tc>, window_params = [{transform_indices = @transform_0, window_bounds = array<i64: 1, 1, 128>}, {transform_indices = @transform_1, window_bounds = array<i64: 1, 1, 256>}]} {
    %c0_i32 = arith.constant 0 : i32
    %0 = arith.cmpi eq, %arg1, %c0_i32 : i32
    %1 = arith.extui %0 : i1 to i32
    %c0_i32_0 = arith.constant 0 : i32
    %2 = arith.cmpi ne, %1, %c0_i32_0 : i32
    scf.if %2 {
      %cst_21 = arith.constant 0.000000e+00 : f32
      %44 = vector.broadcast %cst_21 : f32 to vector<1x1x256xf32>
      %c0_22 = arith.constant 0 : index
      %c0_23 = arith.constant 0 : index
      %c0_24 = arith.constant 0 : index
      %45 = vector.load %arg3[%c0_22, %c0_23, %c0_24] : memref<1x1x256xf32, #tpu.memory_space<vmem>>, vector<1x1x256xf32>
      tpu.vector_store %arg3[%c0_22, %c0_23, %c0_24], %44 {strides = array<i32>} : memref<1x1x256xf32, #tpu.memory_space<vmem>>, vector<1x1x256xf32>,
    } else {
    }
    %3 = tpu.iota {dimensions = array<i32: 1>} : vector<1x256xi32>
    %4 = arith.sitofp %3 : vector<1x256xi32> to vector<1x256xf32>
    %cst = arith.constant 5.000000e-01 : f32
    %5 = vector.broadcast %cst : f32 to vector<1x256xf32>
    %6 = arith.addf %4, %5 : vector<1x256xf32>
    %cst_1 = arith.constant 7.812500e-03 : f32
    %7 = vector.broadcast %cst_1 : f32 to vector<1x256xf32>
    %8 = arith.mulf %6, %7 : vector<1x256xf32>
    %c0 = arith.constant 0 : index
    %c0_2 = arith.constant 0 : index
    %c0_3 = arith.constant 0 : index
    %9 = vector.load %arg2[%c0, %c0_2, %c0_3] : memref<1x1x128xf32, #tpu.memory_space<vmem>>, vector<1x1x128xf32>
    %10 = vector.shape_cast %9 : vector<1x1x128xf32> to vector<128xf32>
    %11 = vector.shape_cast %10 : vector<128xf32> to vector<128x1xf32>
    %12 = vector.broadcast %11 : vector<128x1xf32> to vector<128x256xf32>
    %13 = vector.broadcast %8 : vector<1x256xf32> to vector<128x256xf32>
    %14 = arith.subf %12, %13 : vector<128x256xf32>
    %cst_4 = arith.constant 0.000000e+00 : f32
    %15 = vector.broadcast %cst_4 : f32 to vector<128x256xf32>
    %16 = arith.subf %15, %14 : vector<128x256xf32>
    %cst_5 = arith.constant 3.200000e+02 : f32
    %17 = vector.broadcast %cst_5 : f32 to vector<128x256xf32>
    %18 = arith.mulf %16, %17 : vector<128x256xf32>
    %cst_6 = arith.constant -4.000000e+01 : f32
    %cst_7 = arith.constant 4.000000e+01 : f32
    %19 = vector.broadcast %cst_6 : f32 to vector<128x256xf32>
    %20 = arith.maximumf %19, %18 : vector<128x256xf32>
    %21 = vector.broadcast %cst_7 : f32 to vector<128x256xf32>
    %22 = arith.minimumf %21, %20 : vector<128x256xf32>
    %23 = math.exp %22 : vector<128x256xf32>
    %cst_8 = arith.constant 3.20383811 : f32
    %24 = vector.broadcast %cst_8 : f32 to vector<128x256xf32>
    %25 = arith.mulf %23, %24 : vector<128x256xf32>
    %cst_9 = arith.constant 0.286504805 : f32
    %26 = vector.broadcast %cst_9 : f32 to vector<128x256xf32>
    %27 = arith.mulf %23, %26 : vector<128x256xf32>
    %cst_10 = arith.constant 1.000000e+00 : f32
    %28 = vector.broadcast %cst_10 : f32 to vector<128x256xf32>
    %29 = arith.addf %28, %27 : vector<128x256xf32>
    %cst_11 = arith.constant 3.49034286 : f32
    %30 = vector.broadcast %cst_11 : f32 to vector<128x256xf32>
    %31 = arith.mulf %23, %30 : vector<128x256xf32>
    %cst_12 = arith.constant 1.000000e+00 : f32
    %32 = vector.broadcast %cst_12 : f32 to vector<128x256xf32>
    %33 = arith.addf %32, %31 : vector<128x256xf32>
    %34 = arith.mulf %29, %33 : vector<128x256xf32>
    %35 = arith.divf %25, %34 : vector<128x256xf32>
    %c0_13 = arith.constant 0 : index
    %c0_14 = arith.constant 0 : index
    %c0_15 = arith.constant 0 : index
    %36 = vector.load %arg3[%c0_13, %c0_14, %c0_15] : memref<1x1x256xf32, #tpu.memory_space<vmem>>, vector<1x1x256xf32>
    %cst_16 = arith.constant dense<0.000000e+00> : vector<256xf32>
    %37 = vector.multi_reduction <add>, %35, %cst_16 [0] : vector<128x256xf32> to vector<256xf32>
    %38 = vector.shape_cast %37 : vector<256xf32> to vector<1x1x256xf32>
    %39 = arith.addf %36, %38 : vector<1x1x256xf32>
    %c0_17 = arith.constant 0 : index
    %c0_18 = arith.constant 0 : index
    %c0_19 = arith.constant 0 : index
    %40 = vector.load %arg3[%c0_17, %c0_18, %c0_19] : memref<1x1x256xf32, #tpu.memory_space<vmem>>, vector<1x1x256xf32>
    tpu.vector_store %arg3[%c0_17, %c0_18, %c0_19], %39 {strides = array<i32>} : memref<1x1x256xf32, #tpu.memory_space<vmem>>, vector<1x1x256xf32>,
    %c2_i32 = arith.constant 2 : i32
    %41 = arith.cmpi eq, %arg1, %c2_i32 : i32
    %42 = arith.extui %41 : i1 to i32
    %c0_i32_20 = arith.constant 0 : i32
    %43 = arith.cmpi ne, %42, %c0_i32_20 : i32
    scf.if %43 {
      %c0_21 = arith.constant 0 : index
      %c0_22 = arith.constant 0 : index
      %c0_23 = arith.constant 0 : index
      %44 = vector.load %arg3[%c0_21, %c0_22, %c0_23] : memref<1x1x256xf32, #tpu.memory_space<vmem>>, vector<1x1x256xf32>
      %cst_24 = arith.constant 3.125000e-03 : f32
      %45 = vector.broadcast %cst_24 : f32 to vector<1x1x256xf32>
      %46 = arith.mulf %44, %45 : vector<1x1x256xf32>
      %c0_25 = arith.constant 0 : index
      %c0_26 = arith.constant 0 : index
      %c0_27 = arith.constant 0 : index
      %47 = vector.load %arg3[%c0_25, %c0_26, %c0_27] : memref<1x1x256xf32, #tpu.memory_space<vmem>>, vector<1x1x256xf32>
      tpu.vector_store %arg3[%c0_25, %c0_26, %c0_27], %46 {strides = array<i32>} : memref<1x1x256xf32, #tpu.memory_space<vmem>>, vector<1x1x256xf32>,
    } else {
    }
    return
  }
  func.func @transform_0(%arg0: i32, %arg1: i32) -> (i32, i32, i32) {
    %c0_i32 = arith.constant 0 : i32
    %c0_i32_0 = arith.constant 0 : i32
    return %arg0, %c0_i32, %arg1 : i32, i32, i32
  }
  func.func @transform_1(%arg0: i32, %arg1: i32) -> (i32, i32, i32) {
    %c0_i32 = arith.constant 0 : i32
    %c0_i32_0 = arith.constant 0 : i32
    %c0_i32_1 = arith.constant 0 : i32
    return %arg0, %c0_i32, %c0_i32_0 : i32, i32, i32
  }
}

</mosaic_0001>

<bundles_post_ra>
// kernel: tpu_custom_call.1
= control target key start
LH: loop header
LB: loop body
LE: loop exit
PB: predicated region body
PF: predicated region fallthrough
CT: control target
= control target key end

     0   :  { %6 = vsyncpa [#allocation3], 0  ;;  %s3185_s0 = inlined_call_operand.hbm [shape: f32[2,1,384], index: 0, kind: input, shape index: {}]   ;;  %s3186_s1 = inlined_call_operand.hbm [shape: f32[2,1,256], index: 1, kind: output, shape index: {}]  }
   0x1   :  { %8 = vsyncpa [#allocation3 + $0x1], 0 }
   0x2   :  { %9 = vsyncpa [#allocation4], 0 }
   0x3   :  { %11 = vsyncpa [#allocation4 + $0x1], 0  ;;  %s1774_s6 = smov 0   ;;  %s1776_s7 = smov 0  }
   0x4   :  { %s1778_s8 = smov 0   ;;  %s1780_s9 = smov 0  }
   0x5   :  { %s1782_s10 = smov 0   ;;  %s1784_s11 = smov 0  }
   0x6   :  { %s1786_s12 = smov 0   ;;  %s1788_s13 = smov 0  }
   0x7   :  { %s1790_s14 = smov 0   ;;  %s1792_s15 = smov 0  }
   0x8   :  { %s1794_s16 = smov 0  }
   0x9 LB: > { %s1315_s17 = sadd.s32 4294967295, %s1761_s16   ;;  %s1316_s18 = sadd.s32 4294967294, %s1761_s16   ;;  %s1761_s16 = sphi %s1794_s16, %s17_s16   ;;  %s1757_s15 = sphi %s1792_s15, %s3315_s15   ;;  %s1753_s14 = sphi %s1790_s14, %s3314_s14   ;;  %s1749_s13 = sphi %s1788_s13, %s3313_s13   ;;  %s1745_s12 = sphi %s1786_s12, %s3312_s12   ;;  %s1741_s11 = sphi %s1784_s11, %s3311_s11   ;;  %s1737_s10 = sphi %s1782_s10, %s3310_s10   ;;  %s1733_s9 = sphi %s1780_s9, %s3309_s9   ;;  %s1729_s8 = sphi %s1778_s8, %s3308_s8   ;;  %s1725_s7 = sphi %s1776_s7, %s3307_s7   ;;  %s1721_s6 = sphi %s1774_s6, %s3306_s6  }
   0xa   : > { %s26_s19 = sadd.s32 1, %s1753_s14  ;;  %s29_s20 = sadd.s32 1, %s1757_s15 }
   0xb   : > { %p27_p0 = scmp.ge.s32.totalorder %s26_s19, 3  ;;  %s38_s21 = sadd.s32 1, %s1741_s11 }
   0xc   : > { %p45_p1 = scmp.ne.s32.totalorder %s1741_s11, %s1737_s10  ;;  %p46_p2 = scmp.eq.s32.totalorder %s1761_s16, 0 }
   0xd   : > { %s3317_s19 = smov (%p27_p0, %s26_s19), 0  ;;  %s3319_s20 = smov (!%p27_p0, %s29_s20), %s1757_s15 }
   0xe   : > { %s34_s22 = ssub.s32 %s1753_s14, %s3317_s19  ;;  %p1840_p3 = por %p46_p2, %p45_p1 }
   0xf   : > { %p31_p4 = scmp.ge.s32.totalorder %s3319_s20, 2  ;;  %p51_p5 = scmp.ne.s32.totalorder %s1737_s10, %s1733_s9 }
  0x10   : > { %p52_p6 = scmp.eq.s32.totalorder %s1315_s17, 0  ;;  %s64_s24 = sadd.s32 1, %s1729_s8 }
  0x11   : > { %s3321_s20 = smov (%p31_p4, %s3319_s20), 0  ;;  %p74_p8 = scmp.ne.s32.totalorder %s1729_s8, %s1725_s7 }
  0x12   : > { %3189 = sst [smem:[#allocation8_spill]] %s3321_s20  ;;  %p1848_p7 = por %p52_p6, %p51_p5 }
  0x13   : > { %s33_s26 = ssub.s32 %s1757_s15, %s3321_s20  ;;  %p75_p9 = scmp.eq.s32.totalorder %s1315_s17, 5 }
  0x14   : > { %s35_s27 = sor.u32 %s34_s22, %s33_s26  ;;  %p62_p10 = scmp.eq.s32.totalorder %s33_s26, 0 }
  0x15   : > { %p36_p11 = scmp.eq.s32.totalorder %s35_s27, 0  ;;  %p1856_p12 = por %p75_p9, %p74_p8 }
  0x16   : > { %s1861_s29 = scalar_select %p62_p10, %s1729_s8, %s64_s24  }
  0x17   : > { %s1864_s30 = scalar_select %p36_p11, %s1741_s11, %s38_s21  }
  0x18   : > { %p80_p13 = scmp.ne.s32.totalorder %s1725_s7, %s1721_s6  ;;  %p81_p0 = scmp.eq.s32.totalorder %s1316_s18, 5 }
  0x19   : > { %p1372_p1 = scmp.lt.s32.totalorder %s1761_s16, 6  ;;  %s101_s3 = sand.u32 1, %s1741_s11  }
  0x1a   : > { %p1869_p2 = por %p81_p0, %p80_p13  ;;  %s1359_s4 = smul.u32 3, %s1757_s15 }
  0x1b   : > { %s104_s5 = scalar_lea.vmem [#allocation2], %s101_s3  ;;  %p1365_p4 = pnand %p1372_p1, %p1840_p3 }
  0x1c   : > { %s113_s9 = sshll.u32 %s104_s5, 4  ;;  %s108_s17 = sadd.s32 %s1753_s14, %s1359_s4  ;;  %s114_s9 = int_to_ptr.vmem [resolvable:$true] %s113_s9 }
  0x1d   : > { %p1319_p5 = scmp.ge.s32.totalorder %s1761_s16, 1  ;;  %s109_s21 = scalar_lea.hbm %s3185_s0, %s108_s17 }
  0x1e   : > { %s111_s26 = sshll.u32 %s109_s21, 4  ;;  %p118_p6 = scmp.lt.s32.totalorder %s1761_s16, 7  ;;  %s112_s26 = int_to_ptr.hbm [resolvable:$true] %s111_s26 }
  0x1f   : > { %s102_s18 = scalar_lea.sflag [#allocation3], %s101_s3 }
  0x20   : > { %1367 = dma.hbm_to_vmem [thread:$0]  (!%p1365_p4), %s112_s26, 16, %s114_s9, %s102_s18  }
  0x21   : > { %p119_p8 = pnand %p1319_p5, %p118_p6 }
  0x22   : > { %s124_s27 = sand.u32 (!%p119_p8), 1, %s1737_s10  }
  0x23   : > { %122 = sbr.rel (%p119_p8) target bundleno = 438 (0x1b6), region = 24  ;;  %s125_s5 = scalar_lea.sflag (!%p119_p8), [#allocation3], %s124_s27 }
  0x24   : > { %s127_s20 = scalar_lea.vmem (!%p119_p8), [#allocation2], %s124_s27 }
  0x28   : > { %1712 = dma.done.wait (%p1848_p7), %s125_s5, 16  }
  0x29   : > { %1714 = vsyncadd (%p1848_p7), %s125_s5, 4294967280  ;;  %s143_s23 = sand.u32 1, %s1725_s7   ;;  %p1321_p3 = scmp.ne.s32.totalorder %s1745_s12, 0 }
  0x2a   : > { %s1320_s4 = sshll.u32 %s143_s23, 1 }
  0x2b   : > { %s1891_s17 = scalar_lea.vmem [#allocation5], %s1320_s4  ;;  %149 = sbr.rel (%p1321_p3) target bundleno = 52 (0x34), region = 32 }
  0x30   : > { %v150_v0 = vlaneseq  ;;  %v1763_v1 = vmov 0.0  }
  0x32   : > { %vm152_vm0 = vcmp.lt.s32.totalorder %v150_v0, 256 }
  0x33   : > { %154 = vst.msk [vmem:[%s1891_s17] sm:$0x3] %vm152_vm0, %v1763_v1 }
  0x34 PF: > { %v155_v2 = vlaneseq  ;;  %v1480_v6 = vld [vmem:[%s127_s20] ss:$0 sm:$0xff]  ;;  %p1354_p7 = scmp.ne.s32.totalorder %s1745_s12, 2 }
  0x36   : > { %v167_v3 = vshrl.u32 %v155_v2, 7  ;;  %v156_v20 = vand.u32 127, %v155_v2 }
  0x38   : > { %1463 = vset.pattern.permute.xlu0 %v167_v3  ;;  %v180_v4 = vadd.s32 16, %v167_v3  ;;  %v192_v5 = vadd.s32 32, %v167_v3  ;;  %v174_v7 = vadd.s32 8, %v167_v3  ;;  %v186_v8 = vadd.s32 24, %v167_v3 }
  0x39   : > { %v198_v9 = vadd.s32 40, %v167_v3  ;;  %v216_v10 = vadd.s32 64, %v167_v3  ;;  %v204_v11 = vadd.s32 48, %v167_v3  ;;  %v210_v12 = vadd.s32 56, %v167_v3 }
  0x3a   : > { %1465 = vset.pattern.permute.xlu1 %v180_v4  ;;  %1467 = vset.pattern.permute.xlu2 %v192_v5  ;;  %v246_v13 = vadd.s32 104, %v167_v3  ;;  %v222_v14 = vadd.s32 72, %v167_v3  ;;  %v228_v15 = vadd.s32 80, %v167_v3  ;;  %v234_v16 = vadd.s32 88, %v167_v3 }
  0x3b   : > { %v240_v17 = vadd.s32 96, %v167_v3  ;;  %v258_v18 = vadd.s32 120, %v167_v3  ;;  %v252_v19 = vadd.s32 112, %v167_v3  ;;  %v157_v21 = vadd.s32 128, %v156_v20 }
  0x3c   : > { %v158_v22 = vcvt.s32.f32 %v156_v20 }
  0x3d   : > { %v159_v23 = vcvt.s32.f32 %v157_v21 }
  0x3e   : > { %v160_v24 = vadd.f32 0.5, %v158_v22 }
  0x3f   : > { %v161_v25 = vadd.f32 0.5, %v159_v23 }
  0x40   : > { %170 = vperm.xlu0 %1463, %v1480_v6   ;;  %v1897_v26 = vmul.f32 0.0078125, %v160_v24 }
  0x41   : > { %v1899_v27 = vmul.f32 0.0078125, %v161_v25 }
  0x42   : > { %182 = vperm.xlu1 %1465, %v1480_v6   ;;  %194 = vperm.xlu2 %1467, %v1480_v6  }
  0x48   : > { %1464 = vset.pattern.permute.xlu0 %v174_v7 }
  0x4a   : > { %1466 = vset.pattern.permute.xlu1 %v186_v8  ;;  %1468 = vset.pattern.permute.xlu2 %v198_v9 }
  0x50   : > { %176 = vperm.xlu0 %1464, %v1480_v6  }
  0x52   : > { %188 = vperm.xlu1 %1466, %v1480_v6   ;;  %200 = vperm.xlu2 %1468, %v1480_v6  }
  0x58   : > { %1471 = vset.pattern.permute.xlu0 %v216_v10 }
  0x5a   : > { %1469 = vset.pattern.permute.xlu1 %v204_v11  ;;  %1470 = vset.pattern.permute.xlu2 %v210_v12 }
  0x60   : > { %218 = vperm.xlu0 %1471, %v1480_v6  }
  0x62   : > { %206 = vperm.xlu1 %1469, %v1480_v6   ;;  %212 = vperm.xlu2 %1470, %v1480_v6  }
  0x68   : > { %1476 = vset.pattern.permute.xlu0 %v246_v13 }
  0x6a   : > { %1472 = vset.pattern.permute.xlu1 %v222_v14  ;;  %1473 = vset.pattern.permute.xlu2 %v228_v15 }
  0x70   : > { %248 = vperm.xlu0 %1476, %v1480_v6  }
  0x72   : > { %224 = vperm.xlu1 %1472, %v1480_v6   ;;  %230 = vperm.xlu2 %1473, %v1480_v6  }
  0x78   : > { %1479 = vset.pattern.permute.xlu0 %v258_v18 }
  0x7a   : > { %1474 = vset.pattern.permute.xlu1 %v234_v16  ;;  %1475 = vset.pattern.permute.xlu2 %v240_v17 }
  0x82   : > { %236 = vperm.xlu1 %1474, %v1480_v6   ;;  %242 = vperm.xlu2 %1475, %v1480_v6  }
  0x8a   : > { %1477 = vset.pattern.permute.xlu1 %v252_v19  ;;  %1478 = vset.pattern.permute.xlu2 %v258_v18 }
  0x92   : > { %254 = vperm.xlu1 %1477, %v1480_v6   ;;  %260 = vperm.xlu2 %1478, %v1480_v6  }
  0x9c   : > { %v195_v28 = vpop.permute.xlu2 %194 }
  0x9d   : > { %v270_v29 = vsub.f32 %v195_v28, %v1897_v26  ;;  %v271_v30 = vsub.f32 %v195_v28, %v1899_v27 }
  0x9f   : > { %v302_v31 = vsub.f32 0.0, %v270_v29  ;;  %v303_v32 = vsub.f32 0.0, %v271_v30 }
  0xa1   : > { %v334_v33 = vmul.f32 320.0, %v302_v31  ;;  %v335_v34 = vmul.f32 320.0, %v303_v32 }
  0xa3   : > { %v1330_v35 = vclamps-f32 %v334_v33, 40.0  ;;  %v1331_v36 = vclamps-f32 %v335_v34, 40.0 }
  0xa5   : > { %v438_v37 = vmul.f32 1.442695, %v1330_v35  ;;  %v440_v38 = vmul.f32 1.442695, %v1331_v36 }
  0xa7   : > { %1481 = vpow2.f32 %v438_v37 }
  0xa8   : > { %1483 = vpow2.f32 %v440_v38 }
  0xac   : > { %v201_v39 = vpop.permute.xlu2 %200 }
  0xad   : > { %v272_v40 = vsub.f32 %v201_v39, %v1897_v26  ;;  %v273_v41 = vsub.f32 %v201_v39, %v1899_v27  ;;  %v1905_v43 = vpop.eup %1481 }
  0xae   : > { %v1907_v44 = vpop.eup %1483  ;;  %v526_v47 = vmul.f32 0.2865048, %v1905_v43  ;;  %v590_v48 = vmul.f32 3.4903429, %v1905_v43 }
  0xaf   : > { %v304_v42 = vsub.f32 0.0, %v272_v40  ;;  %v305_v45 = vsub.f32 0.0, %v273_v41  ;;  %v527_v50 = vmul.f32 0.2865048, %v1907_v44  ;;  %v591_v51 = vmul.f32 3.4903429, %v1907_v44 }
  0xb0   : > { %v558_v55 = vadd.f32 1.0, %v526_v47  ;;  %v622_v56 = vadd.f32 1.0, %v590_v48  ;;  %v1950_v47 = vmul.f32 3.203838, %v1907_v44 }
  0xb1   : > { %v336_v46 = vmul.f32 320.0, %v304_v42  ;;  %v337_v52 = vmul.f32 320.0, %v305_v45  ;;  %v559_v58 = vadd.f32 1.0, %v527_v50  ;;  %v623_v59 = vadd.f32 1.0, %v591_v51 }
  0xb2   : > { %v171_v61 = vpop.permute.xlu0 %170  ;;  %v1916_v1 = vmul.f32 %v622_v56, %v558_v55  ;;  %v1945_v45 = vmul.f32 3.203838, %v1905_v43 }
  0xb3   : > { %v1332_v53 = vclamps-f32 %v336_v46, 40.0  ;;  %v1333_v60 = vclamps-f32 %v337_v52, 40.0  ;;  %v262_v0 = vsub.f32 %v171_v61, %v1897_v26  ;;  %v1918_v4 = vmul.f32 %v623_v59, %v559_v58 }
  0xb4   : > { %v183_v49 = vpop.permute.xlu1 %182  ;;  %v263_v5 = vsub.f32 %v171_v61, %v1899_v27  ;;  %vm803_vm1 = vweird.f32 %v1916_v1  ;;  %v807_v48 = vand.u32 2147483647, %v1916_v1  ;;  %v809_v58 = vand.u32 2147483648, %v1916_v1 }
  0xb5   : > { %v266_v54 = vsub.f32 %v183_v49, %v1897_v26  ;;  %v267_v57 = vsub.f32 %v183_v49, %v1899_v27  ;;  %v442_v62 = vmul.f32 1.442695, %v1332_v53  ;;  %v444_v6 = vmul.f32 1.442695, %v1333_v60 }
  0xb6   : > { %v294_v8 = vsub.f32 0.0, %v262_v0  ;;  %v295_v10 = vsub.f32 0.0, %v263_v5  ;;  %vm818_vm2 = vweird.f32 %v1918_v4  ;;  %v822_v59 = vand.u32 2147483647, %v1918_v4 }
  0xb7   : > { %v298_v63 = vsub.f32 0.0, %v266_v54  ;;  %v299_v3 = vsub.f32 0.0, %v267_v57  ;;  %1485 = vpow2.f32 %v442_v62  ;;  %v824_v60 = vand.u32 2147483648, %v1918_v4 }
  0xb8   : > { %1487 = vrcp.f32 %v1916_v1  ;;  %v326_v12 = vmul.f32 320.0, %v294_v8  ;;  %v327_v15 = vmul.f32 320.0, %v295_v10  ;;  %vm1983_vm6 = vcmp.eq.f32.partialorder %v807_v48, 8.507059e+37 }
  0xb9   : > { %v330_v7 = vmul.f32 320.0, %v298_v63  ;;  %v331_v9 = vmul.f32 320.0, %v299_v3  ;;  %1489 = vrcp.f32 %v1918_v4  ;;  %vm2010_vm8 = vcmp.eq.f32.partialorder %v822_v59, 8.507059e+37 }
  0xba   : > { %1491 = vpow2.f32 %v444_v6  ;;  %v1322_v19 = vclamps-f32 %v326_v12, 40.0  ;;  %v1323_v24 = vclamps-f32 %v327_v15, 40.0 }
  0xbb   : > { %v1326_v11 = vclamps-f32 %v330_v7, 40.0  ;;  %v1327_v13 = vclamps-f32 %v331_v9, 40.0 }
  0xbc   : > { %v422_v31 = vmul.f32 1.442695, %v1322_v19  ;;  %v213_v32 = vpop.permute.xlu2 %212  ;;  %v424_v35 = vmul.f32 1.442695, %v1323_v24 }
  0xbd   : > { %v1923_v14 = vpop.eup %1485  ;;  %v430_v18 = vmul.f32 1.442695, %v1326_v11  ;;  %v432_v23 = vmul.f32 1.442695, %v1327_v13  ;;  %v276_v37 = vsub.f32 %v213_v32, %v1897_v26  ;;  %v277_v56 = vsub.f32 %v213_v32, %v1899_v27 }
  0xbe   : > { %v1925_v16 = vpop.eup %1487  ;;  %v528_v21 = vmul.f32 0.2865048, %v1923_v14  ;;  %v592_v22 = vmul.f32 3.4903429, %v1923_v14 }
  0xbf   : > { %v1927_v17 = vpop.eup %1489  ;;  %v799_v25 = vmul.f32 %v1925_v16, %v1916_v1  ;;  %1493 = vpow2.f32 %v430_v18  ;;  %v308_v49 = vsub.f32 0.0, %v276_v37  ;;  %vm804_vm3 = vweird.f32 %v1925_v16 }
  0xc0   : > { %v1929_v20 = vpop.eup %1491  ;;  %v814_v28 = vmul.f32 %v1927_v17, %v1918_v4  ;;  %v560_v33 = vadd.f32 1.0, %v528_v21  ;;  %v624_v34 = vadd.f32 1.0, %v592_v22  ;;  %1495 = vpow2.f32 %v432_v23  ;;  %vm1979_vm5 = vmor %vm803_vm1, %vm804_vm3 }
  0xc1   : > { %v529_v29 = vmul.f32 0.2865048, %v1929_v20  ;;  %v593_v30 = vmul.f32 3.4903429, %v1929_v20  ;;  %v800_v36 = vsub.f32 1.0, %v799_v25  ;;  %1497 = vpow2.f32 %v422_v31 }
  0xc2   : > { %v815_v38 = vsub.f32 1.0, %v814_v28  ;;  %v1940_v41 = vmul.f32 %v624_v34, %v560_v33  ;;  %1499 = vpow2.f32 %v424_v35  ;;  %vm819_vm4 = vweird.f32 %v1927_v17  ;;  %v177_v57 = vpop.permute.xlu0 %176 }
  0xc3   : > { %v561_v39 = vadd.f32 1.0, %v529_v29  ;;  %v625_v40 = vadd.f32 1.0, %v593_v30  ;;  %v801_v50 = vmul.f32 %v1925_v16, %v800_v36  ;;  %v340_v61 = vmul.f32 320.0, %v308_v49  ;;  %vm1993_vm7 = vmor %vm818_vm2, %vm819_vm4 }
  0xc4   : > { %v816_v51 = vmul.f32 %v1927_v17, %v815_v38  ;;  %1501 = vrcp.f32 %v1940_v41  ;;  %v264_v9 = vsub.f32 %v177_v57, %v1897_v26  ;;  %v309_v13 = vsub.f32 0.0, %v277_v56 }
  0xc5   : > { %v1942_v42 = vpop.eup %1493  ;;  %v1957_v52 = vmul.f32 %v625_v40, %v561_v39  ;;  %v802_v63 = vadd.f32 %v1925_v16, %v801_v50  ;;  %v810_v18 = vor.u32 1.1754944e-38, %v809_v58  ;;  %v1336_v21 = vclamps-f32 %v340_v61, 40.0 }
  0xc6   : > { %v1947_v46 = vpop.eup %1495  ;;  %v522_v43 = vmul.f32 0.2865048, %v1942_v42  ;;  %v586_v44 = vmul.f32 3.4903429, %v1942_v42  ;;  %v817_v5 = vadd.f32 %v1927_v17, %v816_v51  ;;  %v825_v25 = vor.u32 1.1754944e-38, %v824_v60 }
  0xc7   : > { %v1963_v53 = vpop.eup %1497  ;;  %v523_v54 = vmul.f32 0.2865048, %v1947_v46  ;;  %v587_v55 = vmul.f32 3.4903429, %v1947_v46  ;;  %1503 = vrcp.f32 %v1957_v52  ;;  %v806_v22 = vsel %vm1979_vm5, %v1925_v16, %v802_v63 }
  0xc8   : > { %v1972_v62 = vpop.eup %1499  ;;  %v554_v1 = vadd.f32 1.0, %v522_v43  ;;  %v618_v7 = vadd.f32 1.0, %v586_v44  ;;  %v518_v8 = vmul.f32 0.2865048, %v1963_v53  ;;  %v582_v12 = vmul.f32 3.4903429, %v1963_v53 }
  0xc9   : > { %v555_v10 = vadd.f32 1.0, %v523_v54  ;;  %v619_v11 = vadd.f32 1.0, %v587_v55  ;;  %v519_v4 = vmul.f32 0.2865048, %v1972_v62  ;;  %v583_v19 = vmul.f32 3.4903429, %v1972_v62 }
  0xca   : > { %v2000_v15 = vpop.eup %1501  ;;  %v821_v23 = vsel %vm1993_vm7, %v1927_v17, %v817_v5  ;;  %v2014_v28 = vmul.f32 %v618_v7, %v554_v1  ;;  %v550_v29 = vadd.f32 1.0, %v518_v8  ;;  %v265_v30 = vsub.f32 %v177_v57, %v1899_v27 }
  0xcb   : > { %v296_v31 = vsub.f32 0.0, %v264_v9  ;;  %v829_v16 = vmul.f32 %v2000_v15, %v1940_v41  ;;  %v2021_v33 = vmul.f32 %v619_v11, %v555_v10  ;;  %v614_v34 = vadd.f32 1.0, %v582_v12 }
  0xcc   : > { %v341_v17 = vmul.f32 320.0, %v309_v13  ;;  %v551_v35 = vadd.f32 1.0, %v519_v4  ;;  %v615_v36 = vadd.f32 1.0, %v583_v19  ;;  %v450_v37 = vmul.f32 1.442695, %v1336_v21 }
  0xcd   : > { %v2017_v32 = vpop.eup %1503  ;;  %v297_v38 = vsub.f32 0.0, %v265_v30  ;;  %v2024_v39 = vmul.f32 3.203838, %v1923_v14  ;;  %v2027_v40 = vmul.f32 3.203838, %v1929_v20  ;;  %v328_v48 = vmul.f32 320.0, %v296_v31  ;;  %v189_v20 = vpop.permute.xlu1 %188 }
  0xce   : > { %v811_v49 = vsel %vm1983_vm6, %v810_v18, %v806_v22  ;;  %v826_v50 = vsel %vm2010_vm8, %v825_v25, %v821_v23  ;;  %1505 = vrcp.f32 %v2014_v28  ;;  %v844_v43 = vmul.f32 %v2017_v32, %v1957_v52 }
  0xcf   : > { %v329_v51 = vmul.f32 320.0, %v297_v38  ;;  %1507 = vrcp.f32 %v2021_v33  ;;  %v2037_v14 = vmul.f32 %v614_v34, %v550_v29  ;;  %v1337_v44 = vclamps-f32 %v341_v17, 40.0 }
  0xd0   : > { %v830_v54 = vsub.f32 1.0, %v829_v16  ;;  %v837_v55 = vand.u32 2147483647, %v1940_v41  ;;  %v2040_v56 = vmul.f32 %v615_v36, %v551_v35  ;;  %1509 = vpow2.f32 %v450_v37 }
  0xd1   : > { %v2043_v57 = vmul.f32 %v811_v49, %v1945_v45  ;;  %v2046_v58 = vmul.f32 %v826_v50, %v1950_v47  ;;  %v839_v59 = vand.u32 2147483648, %v1940_v41  ;;  %v1324_v60 = vclamps-f32 %v328_v48, 40.0 }
  0xd2   : > { %vm833_vm9 = vweird.f32 %v1940_v41  ;;  %v854_v61 = vand.u32 2147483648, %v1957_v52  ;;  %v1325_v63 = vclamps-f32 %v329_v51, 40.0  ;;  %v268_v0 = vsub.f32 %v189_v20, %v1897_v26 }
  0xd3   : > { %v845_v3 = vsub.f32 1.0, %v844_v43  ;;  %vm848_vm10 = vweird.f32 %v1957_v52  ;;  %1511 = vrcp.f32 %v2037_v14  ;;  %v452_v45 = vmul.f32 1.442695, %v1337_v44 }
  0xd4   : > { %v2054_v5 = vpop.eup %1505  ;;  %v831_v47 = vmul.f32 %v2000_v15, %v830_v54  ;;  %vm2057_vm11 = vcmp.eq.f32.partialorder %v837_v55, 8.507059e+37  ;;  %v852_v1 = vand.u32 2147483647, %v1957_v52  ;;  %1513 = vrcp.f32 %v2040_v56 }
  0xd5   : > { %v2063_v7 = vpop.eup %1507  ;;  %v840_v8 = vor.u32 1.1754944e-38, %v839_v59  ;;  %v2066_v9 = vmul.f32 3.203838, %v1963_v53  ;;  %v426_v10 = vmul.f32 1.442695, %v1324_v60  ;;  %v269_v11 = vsub.f32 %v189_v20, %v1899_v27 }
  0xd6   : > { %v2069_v12 = vpop.eup %1509  ;;  %vm834_vm12 = vweird.f32 %v2000_v15  ;;  %v2072_v13 = vor.u32 1.1754944e-38, %v854_v61  ;;  %v428_v18 = vmul.f32 1.442695, %v1325_v63  ;;  %v300_v4 = vsub.f32 0.0, %v268_v0 }
  0xd7   : > { %v846_v19 = vmul.f32 %v2017_v32, %v845_v3  ;;  %v2076_v21 = vmul.f32 3.203838, %v1942_v42  ;;  %v749_v22 = vand.u32 2147483648, %v2014_v28  ;;  %1515 = vpow2.f32 %v452_v45  ;;  %vm2089_vm14 = vmor %vm833_vm9, %vm834_vm12 }
  0xd8   : > { %v832_v53 = vadd.f32 %v2000_v15, %v831_v47  ;;  %vm849_vm13 = vweird.f32 %v2017_v32  ;;  %v739_v23 = vmul.f32 %v2054_v5, %v2014_v28  ;;  %v754_v24 = vmul.f32 %v2063_v7, %v2021_v33 }
  0xd9   : > { %v2085_v25 = vpop.eup %1511  ;;  %v532_v29 = vmul.f32 0.2865048, %v2069_v12  ;;  %v596_v30 = vmul.f32 3.4903429, %v2069_v12  ;;  %1517 = vpow2.f32 %v426_v10  ;;  %v301_v31 = vsub.f32 0.0, %v269_v11  ;;  %vm2115_vm15 = vmor %vm848_vm10, %vm849_vm13 }
  0xda   : > { %v2095_v16 = vpop.eup %1513  ;;  %v2098_v34 = vmul.f32 3.203838, %v1947_v46  ;;  %v764_v17 = vand.u32 2147483648, %v2021_v33  ;;  %1519 = vpow2.f32 %v428_v18  ;;  %v332_v35 = vmul.f32 320.0, %v300_v4 }
  0xdb   : > { %v2102_v41 = vadd.f32 %v2017_v32, %v846_v19  ;;  %v747_v36 = vand.u32 2147483647, %v2014_v28  ;;  %v2105_v37 = vor.u32 1.1754944e-38, %v749_v22  ;;  %v762_v38 = vand.u32 2147483647, %v2021_v33 }
  0xdc   : > { %v836_v48 = vsel %vm2089_vm14, %v2000_v15, %v832_v53  ;;  %v740_v49 = vsub.f32 1.0, %v739_v23  ;;  %v755_v50 = vsub.f32 1.0, %v754_v24  ;;  %v679_v51 = vmul.f32 %v2085_v25, %v2037_v14  ;;  %v231_v53 = vpop.permute.xlu2 %230 }
  0xdd   : > { %v2121_v43 = vpop.eup %1515  ;;  %vm2123_vm0 = vcmp.eq.f32.partialorder %v852_v1, 8.507059e+37  ;;  %v694_v15 = vmul.f32 %v2095_v16, %v2040_v56  ;;  %v564_v20 = vadd.f32 1.0, %v532_v29  ;;  %v628_v52 = vadd.f32 1.0, %v596_v30 }
  0xde   : > { %v333_v54 = vmul.f32 320.0, %v301_v31  ;;  %vm743_vm1 = vweird.f32 %v2014_v28  ;;  %v2130_v55 = vor.u32 1.1754944e-38, %v764_v17  ;;  %vm683_vm2 = vweird.f32 %v2037_v14 }
  0xdf   : > { %v687_v59 = vand.u32 2147483647, %v2037_v14  ;;  %v1328_v60 = vclamps-f32 %v332_v35, 40.0  ;;  %v2134_v61 = vpop.eup %1517  ;;  %v2138_v63 = vsel %vm2057_vm11, %v840_v8, %v836_v48  ;;  %v851_v0 = vsel %vm2115_vm15, %v2017_v32, %v2102_v41 }
  0xe0   : > { %vm744_vm3 = vweird.f32 %v2054_v5  ;;  %vm758_vm4 = vweird.f32 %v2021_v33  ;;  %v689_v3 = vand.u32 2147483648, %v2037_v14  ;;  %v2147_v45 = vpop.eup %1519  ;;  %v741_v47 = vmul.f32 %v2054_v5, %v740_v49 }
  0xe1   : > { %v756_v1 = vmul.f32 %v2063_v7, %v755_v50  ;;  %v533_v6 = vmul.f32 0.2865048, %v2121_v43  ;;  %v597_v8 = vmul.f32 3.4903429, %v2121_v43  ;;  %v680_v10 = vsub.f32 1.0, %v679_v51  ;;  %v207_v51 = vpop.permute.xlu1 %206  ;;  %vm2180_vm10 = vmor %vm743_vm1, %vm744_vm3 }
  0xe2   : > { %v695_v11 = vsub.f32 1.0, %v694_v15  ;;  %v2153_v18 = vmul.f32 %v628_v52, %v564_v20  ;;  %v1329_v32 = vclamps-f32 %v333_v54, 40.0  ;;  %vm698_vm5 = vweird.f32 %v2040_v56 }
  0xe3   : > { %v520_v4 = vmul.f32 0.2865048, %v2134_v61  ;;  %v584_v19 = vmul.f32 3.4903429, %v2134_v61  ;;  %v434_v22 = vmul.f32 1.442695, %v1328_v60  ;;  %vm759_vm7 = vweird.f32 %v2063_v7 }
  0xe4   : > { %vm2158_vm6 = vcmp.eq.f32.partialorder %v747_v36, 8.507059e+37  ;;  %vm684_vm8 = vweird.f32 %v2085_v25  ;;  %v521_v24 = vmul.f32 0.2865048, %v2147_v45  ;;  %v585_v42 = vmul.f32 3.4903429, %v2147_v45  ;;  %vm2196_vm12 = vmor %vm758_vm4, %vm759_vm7 }
  0xe5   : > { %v742_v29 = vadd.f32 %v2054_v5, %v741_v47  ;;  %v757_v30 = vadd.f32 %v2063_v7, %v756_v1  ;;  %vm2168_vm9 = vcmp.eq.f32.partialorder %v762_v38, 8.507059e+37  ;;  %v565_v17 = vadd.f32 1.0, %v533_v6  ;;  %vm2211_vm13 = vmor %vm683_vm2, %vm684_vm8  ;;  %v219_v6 = vpop.permute.xlu0 %218 }
  0xe6   : > { %v629_v35 = vadd.f32 1.0, %v597_v8  ;;  %v681_v41 = vmul.f32 %v2085_v25, %v680_v10  ;;  %v696_v36 = vmul.f32 %v2095_v16, %v695_v11  ;;  %1521 = vrcp.f32 %v2153_v18 }
  0xe7   : > { %v282_v48 = vsub.f32 %v231_v53, %v1897_v26  ;;  %v552_v46 = vadd.f32 1.0, %v520_v4  ;;  %v616_v49 = vadd.f32 1.0, %v584_v19  ;;  %1523 = vpow2.f32 %v434_v22 }
  0xe8   : > { %v436_v50 = vmul.f32 1.442695, %v1329_v32  ;;  %vm699_vm11 = vweird.f32 %v2095_v16  ;;  %v702_v15 = vand.u32 2147483647, %v2040_v56  ;;  %v553_v20 = vadd.f32 1.0, %v521_v24 }
  0xe9   : > { %v617_v52 = vadd.f32 1.0, %v585_v42  ;;  %v856_v54 = vsel %vm2123_vm0, %v2072_v13, %v851_v0  ;;  %v746_v60 = vsel %vm2180_vm10, %v2054_v5, %v742_v29  ;;  %v704_v47 = vand.u32 2147483648, %v2040_v56  ;;  %vm2219_vm14 = vmor %vm698_vm5, %vm699_vm11 }
  0xea   : > { %v2201_v1 = vmul.f32 %v629_v35, %v565_v17  ;;  %v761_v13 = vsel %vm2196_vm12, %v2063_v7, %v757_v30  ;;  %v682_v44 = vadd.f32 %v2085_v25, %v681_v41  ;;  %v697_v5 = vadd.f32 %v2095_v16, %v696_v36 }
  0xeb   : > { %v274_v0 = vsub.f32 %v207_v51, %v1897_v26  ;;  %v2223_v7 = vmul.f32 %v616_v49, %v552_v46  ;;  %1525 = vpow2.f32 %v436_v50  ;;  %v283_v8 = vsub.f32 %v231_v53, %v1899_v27 }
  0xec   : > { %v314_v14 = vsub.f32 0.0, %v282_v48  ;;  %v2226_v10 = vpop.eup %1521  ;;  %vm2228_vm15 = vcmp.eq.f32.partialorder %v687_v59, 8.507059e+37  ;;  %v690_v32 = vor.u32 1.1754944e-38, %v689_v3  ;;  %vm2232_vm0 = vcmp.eq.f32.partialorder %v702_v15, 8.507059e+37 }
  0xed   : > { %v2236_v56 = vmul.f32 %v617_v52, %v553_v20  ;;  %v2238_v19 = vpop.eup %1523  ;;  %v751_v22 = vsel %vm2158_vm6, %v2105_v37, %v746_v60  ;;  %v705_v53 = vor.u32 1.1754944e-38, %v704_v47  ;;  %1527 = vrcp.f32 %v2201_v1 }
  0xee   : > { %v275_v59 = vsub.f32 %v207_v51, %v1899_v27  ;;  %v766_v3 = vsel %vm2168_vm9, %v2130_v55, %v761_v13  ;;  %v686_v24 = vsel %vm2211_vm13, %v2085_v25, %v682_v44  ;;  %v701_v42 = vsel %vm2219_vm14, %v2095_v16, %v697_v5 }
  0xef   : > { %v306_v29 = vsub.f32 0.0, %v274_v0  ;;  %v889_v37 = vmul.f32 %v2226_v10, %v2153_v18  ;;  %1529 = vrcp.f32 %v2223_v7  ;;  %v315_v23 = vsub.f32 0.0, %v283_v8 }
  0xf0   : > { %v346_v30 = vmul.f32 320.0, %v314_v14  ;;  %v487_v17 = vmul.f32 3.203838, %v1972_v62  ;;  %1531 = vrcp.f32 %v2236_v56  ;;  %v524_v55 = vmul.f32 0.2865048, %v2238_v19 }
  0xf1   : > { %v588_v25 = vmul.f32 3.4903429, %v2238_v19  ;;  %v2261_v31 = vpop.eup %1525  ;;  %v2265_v16 = vmul.f32 %v2138_v63, %v2024_v39  ;;  %v2268_v35 = vmul.f32 %v856_v54, %v2027_v40  ;;  %v2271_v41 = vmul.f32 %v751_v22, %v2076_v21 }
  0xf2   : > { %v307_v36 = vsub.f32 0.0, %v275_v59  ;;  %v2274_v62 = vmul.f32 %v766_v3, %v2098_v34  ;;  %v691_v48 = vsel %vm2228_vm15, %v690_v32, %v686_v24  ;;  %v706_v46 = vsel %vm2232_vm0, %v705_v53, %v701_v42 }
  0xf3   : > { %v338_v49 = vmul.f32 320.0, %v306_v29  ;;  %v2280_v50 = vpop.eup %1527  ;;  %v890_v39 = vsub.f32 1.0, %v889_v37  ;;  %v897_v40 = vand.u32 2147483647, %v2153_v18  ;;  %v347_v63 = vmul.f32 320.0, %v315_v23 }
  0xf4   : > { %v1342_v51 = vclamps-f32 %v346_v30, 40.0  ;;  %v525_v21 = vmul.f32 0.2865048, %v2261_v31  ;;  %v556_v38 = vadd.f32 1.0, %v524_v55  ;;  %v589_v34 = vmul.f32 3.4903429, %v2261_v31 }
  0xf5   : > { %v620_v15 = vadd.f32 1.0, %v588_v25  ;;  %v2285_v20 = vpop.eup %1529  ;;  %v2288_v52 = vmul.f32 %v691_v48, %v2066_v9  ;;  %v2291_v54 = vmul.f32 3.203838, %v2069_v12  ;;  %v2294_v60 = vmul.f32 3.203838, %v2121_v43 }
  0xf6   : > { %v339_v28 = vmul.f32 320.0, %v307_v36  ;;  %v2296_v47 = vpop.eup %1531  ;;  %v2298_v13 = vmul.f32 %v706_v46, %v487_v17  ;;  %vm893_vm1 = vweird.f32 %v2153_v18  ;;  %v904_v44 = vmul.f32 %v2280_v50, %v2201_v1 }
  0xf7   : > { %v1334_v33 = vclamps-f32 %v338_v49, 40.0  ;;  %v899_v9 = vand.u32 2147483648, %v2153_v18  ;;  %v914_v5 = vand.u32 2147483648, %v2201_v1  ;;  %v1343_v12 = vclamps-f32 %v347_v63, 40.0 }
  0xf8   : > { %v462_v0 = vmul.f32 1.442695, %v1342_v51  ;;  %v891_v43 = vmul.f32 %v2226_v10, %v890_v39  ;;  %vm2306_vm2 = vcmp.eq.f32.partialorder %v897_v40, 8.507059e+37  ;;  %v557_v14 = vadd.f32 1.0, %v525_v21 }
  0xf9   : > { %v621_v11 = vadd.f32 1.0, %v589_v34  ;;  %v2310_v32 = vmul.f32 %v620_v15, %v556_v38  ;;  %vm908_vm3 = vweird.f32 %v2201_v1  ;;  %v709_v4 = vmul.f32 %v2285_v20, %v2223_v7 }
  0xfa   : > { %v724_v22 = vmul.f32 %v2296_v47, %v2236_v56  ;;  %v1335_v53 = vclamps-f32 %v339_v28, 40.0  ;;  %vm894_vm4 = vweird.f32 %v2226_v10  ;;  %v905_v59 = vsub.f32 1.0, %v904_v44 }
  0xfb   : > { %v446_v3 = vmul.f32 1.442695, %v1334_v33  ;;  %v278_v24 = vsub.f32 %v219_v6, %v1897_v26  ;;  %v900_v42 = vor.u32 1.1754944e-38, %v899_v9  ;;  %v912_v29 = vand.u32 2147483647, %v2201_v1  ;;  %vm2328_vm5 = vmor %vm893_vm1, %vm894_vm4 }
  0xfc   : > { %1533 = vpow2.f32 %v462_v0  ;;  %v464_v37 = vmul.f32 1.442695, %v1343_v12  ;;  %v892_v23 = vadd.f32 %v2226_v10, %v891_v43  ;;  %v2321_v30 = vor.u32 1.1754944e-38, %v914_v5 }
  0xfd   : > { %v2323_v17 = vmul.f32 %v621_v11, %v557_v14  ;;  %1535 = vrcp.f32 %v2310_v32  ;;  %v710_v25 = vsub.f32 1.0, %v709_v4  ;;  %v725_v36 = vsub.f32 1.0, %v724_v22 }
  0xfe   : > { %v448_v48 = vmul.f32 1.442695, %v1335_v53  ;;  %v279_v46 = vsub.f32 %v219_v6, %v1899_v27  ;;  %v906_v49 = vmul.f32 %v2280_v50, %v905_v59  ;;  %v2335_v39 = vmul.f32 3.203838, %v2134_v61 }
  0xff   : > { %1537 = vpow2.f32 %v446_v3  ;;  %v310_v40 = vsub.f32 0.0, %v278_v24  ;;  %vm909_vm6 = vweird.f32 %v2280_v50  ;;  %v2339_v18 = vmul.f32 3.203838, %v2147_v45 }
 0x100   : > { %vm713_vm7 = vweird.f32 %v2223_v7  ;;  %1539 = vpow2.f32 %v464_v37  ;;  %v896_v63 = vsel %vm2328_vm5, %v2226_v10, %v892_v23  ;;  %vm2345_vm8 = vcmp.eq.f32.partialorder %v912_v29, 8.507059e+37  ;;  %vm2367_vm11 = vmor %vm908_vm3, %vm909_vm6 }
 0x101   : > { %v717_v61 = vand.u32 2147483647, %v2223_v7  ;;  %v719_v21 = vand.u32 2147483648, %v2223_v7  ;;  %1541 = vrcp.f32 %v2323_v17  ;;  %v711_v45 = vmul.f32 %v2285_v20, %v710_v25  ;;  %v225_v7 = vpop.permute.xlu1 %224 }
 0x102   : > { %v2352_v38 = vpop.eup %1533  ;;  %v726_v34 = vmul.f32 %v2296_v47, %v725_v36  ;;  %1543 = vpow2.f32 %v448_v48  ;;  %v311_v15 = vsub.f32 0.0, %v279_v46  ;;  %v907_v10 = vadd.f32 %v2280_v50, %v906_v49 }
 0x103   : > { %v2356_v28 = vpop.eup %1535  ;;  %vm714_vm9 = vweird.f32 %v2285_v20  ;;  %vm728_vm10 = vweird.f32 %v2236_v56  ;;  %v342_v44 = vmul.f32 320.0, %v310_v40  ;;  %v901_v33 = vsel %vm2306_vm2, %v900_v42, %v896_v63 }
 0x104   : > { %vm729_vm12 = vweird.f32 %v2296_v47  ;;  %v732_v5 = vand.u32 2147483647, %v2236_v56  ;;  %v734_v12 = vand.u32 2147483648, %v2236_v56  ;;  %vm2376_vm13 = vcmp.eq.f32.partialorder %v717_v61, 8.507059e+37  ;;  %vm2389_vm14 = vmor %vm713_vm7, %vm714_vm9 }
 0x105   : > { %v2374_v0 = vpop.eup %1537  ;;  %v720_v43 = vor.u32 1.1754944e-38, %v719_v21  ;;  %v538_v8 = vmul.f32 0.2865048, %v2352_v38  ;;  %v602_v1 = vmul.f32 3.4903429, %v2352_v38  ;;  %v712_v11 = vadd.f32 %v2285_v20, %v711_v45  ;;  %vm2408_vm15 = vmor %vm728_vm10, %vm729_vm12 }
 0x106   : > { %v2382_v14 = vpop.eup %1539  ;;  %v727_v22 = vadd.f32 %v2296_v47, %v726_v34  ;;  %v769_v53 = vmul.f32 %v2356_v28, %v2310_v32  ;;  %v343_v59 = vmul.f32 320.0, %v311_v15  ;;  %v2399_v24 = vmul.f32 %v901_v33, %v2291_v54 }
 0x107   : > { %v2396_v3 = vpop.eup %1541  ;;  %v911_v42 = vsel %vm2367_vm11, %v2280_v50, %v907_v10  ;;  %v2413_v29 = vmul.f32 3.203838, %v2238_v19  ;;  %v1338_v37 = vclamps-f32 %v342_v44, 40.0  ;;  %vm2417_vm0 = vcmp.eq.f32.partialorder %v732_v5, 8.507059e+37 }
 0x108   : > { %v2415_v23 = vpop.eup %1543  ;;  %v735_v55 = vor.u32 1.1754944e-38, %v734_v12  ;;  %v530_v50 = vmul.f32 0.2865048, %v2374_v0  ;;  %v594_v25 = vmul.f32 3.4903429, %v2374_v0  ;;  %v570_v36 = vadd.f32 1.0, %v538_v8 }
 0x109   : > { %v539_v56 = vmul.f32 0.2865048, %v2382_v14  ;;  %v603_v48 = vmul.f32 3.4903429, %v2382_v14  ;;  %v634_v46 = vadd.f32 1.0, %v602_v1  ;;  %v716_v19 = vsel %vm2389_vm14, %v2285_v20, %v712_v11  ;;  %v243_v1 = vpop.permute.xlu2 %242 }
 0x10a   : > { %v731_v49 = vsel %vm2408_vm15, %v2296_v47, %v727_v22  ;;  %v770_v40 = vsub.f32 1.0, %v769_v53  ;;  %v1339_v63 = vclamps-f32 %v343_v59, 40.0  ;;  %v784_v61 = vmul.f32 %v2396_v3, %v2323_v17 }
 0x10b   : > { %v531_v21 = vmul.f32 0.2865048, %v2415_v23  ;;  %v595_v45 = vmul.f32 3.4903429, %v2415_v23  ;;  %v454_v34 = vmul.f32 1.442695, %v1338_v37  ;;  %v916_v15 = vsel %vm2345_vm8, %v2321_v30, %v911_v42 }
 0x10c   : > { %v2439_v20 = vmul.f32 3.203838, %v2261_v31  ;;  %v562_v10 = vadd.f32 1.0, %v530_v50  ;;  %v626_v44 = vadd.f32 1.0, %v594_v25  ;;  %v777_v47 = vand.u32 2147483647, %v2310_v32 }
 0x10d   : > { %v571_v33 = vadd.f32 1.0, %v539_v56  ;;  %v635_v9 = vadd.f32 1.0, %v603_v48  ;;  %v2442_v5 = vmul.f32 %v634_v46, %v570_v36  ;;  %v721_v12 = vsel %vm2376_vm13, %v720_v43, %v716_v19 }
 0x10e   : > { %v736_v8 = vsel %vm2417_vm0, %v735_v55, %v731_v49  ;;  %v771_v51 = vmul.f32 %v2356_v28, %v770_v40  ;;  %v456_v30 = vmul.f32 1.442695, %v1339_v63  ;;  %v785_v31 = vsub.f32 1.0, %v784_v61 }
 0x10f   : > { %v563_v11 = vadd.f32 1.0, %v531_v21  ;;  %v627_v4 = vadd.f32 1.0, %v595_v45  ;;  %1545 = vpow2.f32 %v454_v34  ;;  %v2450_v22 = vmul.f32 %v916_v15, %v2294_v60 }
 0x110   : > { %vm773_vm1 = vweird.f32 %v2310_v32  ;;  %v779_v53 = vand.u32 2147483648, %v2310_v32  ;;  %v2454_v6 = vmul.f32 %v626_v44, %v562_v10  ;;  %v722_v43 = vmul.f32 %v721_v12, %v2335_v39 }
 0x111   : > { %vm788_vm2 = vweird.f32 %v2323_v17  ;;  %v2458_v59 = vmul.f32 %v635_v9, %v571_v33  ;;  %1547 = vrcp.f32 %v2442_v5  ;;  %v286_v42 = vsub.f32 %v243_v1, %v1897_v26 }
 0x112   : > { %v737_v60 = vmul.f32 %v736_v8, %v2339_v18  ;;  %vm2463_vm3 = vcmp.eq.f32.partialorder %v777_v47, 8.507059e+37  ;;  %v792_v54 = vand.u32 2147483647, %v2323_v17  ;;  %1549 = vpow2.f32 %v456_v30 }
 0x113   : > { %v772_v39 = vadd.f32 %v2356_v28, %v771_v51  ;;  %vm774_vm4 = vweird.f32 %v2356_v28  ;;  %v786_v55 = vmul.f32 %v2396_v3, %v785_v31  ;;  %v2471_v50 = vmul.f32 %v627_v4, %v563_v11 }
 0x114   : > { %v780_v25 = vor.u32 1.1754944e-38, %v779_v53  ;;  %v794_v56 = vand.u32 2147483648, %v2323_v17  ;;  %1551 = vrcp.f32 %v2454_v6  ;;  %v280_v18 = vsub.f32 %v225_v7, %v1897_v26  ;;  %vm2484_vm5 = vmor %vm773_vm1, %vm774_vm4 }
 0x115   : > { %v2476_v36 = vpop.eup %1545  ;;  %v1159_v48 = vadd.f32 %v722_v43, %v2288_v52  ;;  %1553 = vrcp.f32 %v2458_v59  ;;  %v287_v46 = vsub.f32 %v243_v1, %v1899_v27  ;;  %v318_v19 = vsub.f32 0.0, %v286_v42 }
 0x116   : > { %v1180_v49 = vadd.f32 %v737_v60, %v2298_v13  ;;  %vm2488_vm6 = vcmp.eq.f32.partialorder %v792_v54, 8.507059e+37  ;;  %v2493_v61 = vmul.f32 3.203838, %v2352_v38  ;;  %v281_v52 = vsub.f32 %v225_v7, %v1899_v27 }
 0x117   : > { %v2496_v21 = vpop.eup %1547  ;;  %v776_v13 = vsel %vm2484_vm5, %v2356_v28, %v772_v39  ;;  %v787_v32 = vadd.f32 %v2396_v3, %v786_v55  ;;  %vm789_vm7 = vweird.f32 %v2396_v3  ;;  %1555 = vrcp.f32 %v2471_v50 }
 0x118   : > { %v2504_v45 = vpop.eup %1549  ;;  %v795_v34 = vor.u32 1.1754944e-38, %v794_v56  ;;  %v534_v38 = vmul.f32 0.2865048, %v2476_v36  ;;  %v598_v15 = vmul.f32 3.4903429, %v2476_v36  ;;  %v312_v10 = vsub.f32 0.0, %v280_v18  ;;  %vm2518_vm8 = vmor %vm788_vm2, %vm789_vm7 }
 0x119   : > { %v1160_v44 = vadd.f32 %v1159_v48, %v2271_v41  ;;  %v2510_v47 = vmul.f32 3.203838, %v2382_v14  ;;  %v319_v28 = vsub.f32 0.0, %v287_v46  ;;  %v350_v33 = vmul.f32 320.0, %v318_v19 }
 0x11a   : > { %v2512_v9 = vpop.eup %1551  ;;  %v781_v12 = vsel %vm2463_vm3, %v780_v25, %v776_v13  ;;  %v1181_v51 = vadd.f32 %v1180_v49, %v2274_v62  ;;  %v979_v41 = vmul.f32 %v2496_v21, %v2442_v5  ;;  %v313_v14 = vsub.f32 0.0, %v281_v52 }
 0x11b   : > { %v2525_v30 = vpop.eup %1553  ;;  %v791_v1 = vsel %vm2518_vm8, %v2396_v3, %v787_v32  ;;  %v989_v31 = vand.u32 2147483648, %v2442_v5  ;;  %v535_v17 = vmul.f32 0.2865048, %v2504_v45  ;;  %v599_v11 = vmul.f32 3.4903429, %v2504_v45 }
 0x11c   : > { %vm983_vm9 = vweird.f32 %v2442_v5  ;;  %v987_v62 = vand.u32 2147483647, %v2442_v5  ;;  %v566_v4 = vadd.f32 1.0, %v534_v38  ;;  %v630_v53 = vadd.f32 1.0, %v598_v15 }
 0x11d   : > { %v344_v43 = vmul.f32 320.0, %v312_v10  ;;  %v2535_v42 = vpop.eup %1555  ;;  %v782_v7 = vmul.f32 %v781_v12, %v2413_v29  ;;  %v859_v3 = vmul.f32 %v2512_v9, %v2454_v6  ;;  %v351_v60 = vmul.f32 320.0, %v319_v28 }
 0x11e   : > { %v1346_v37 = vclamps-f32 %v350_v33, 40.0  ;;  %v796_v54 = vsel %vm2488_vm6, %v795_v34, %v791_v1  ;;  %v980_v39 = vsub.f32 1.0, %v979_v41  ;;  %v994_v55 = vmul.f32 %v2525_v30, %v2458_v59 }
 0x11f   : > { %v345_v25 = vmul.f32 320.0, %v313_v14  ;;  %v2544_v56 = vor.u32 1.1754944e-38, %v989_v31  ;;  %v1004_v18 = vand.u32 2147483648, %v2458_v59  ;;  %v567_v48 = vadd.f32 1.0, %v535_v17  ;;  %v2572_v31 = vpop.permute.xlu0 %248 }
 0x120   : > { %v631_v46 = vadd.f32 1.0, %v599_v11  ;;  %vm998_vm10 = vweird.f32 %v2458_v59  ;;  %v1002_v29 = vand.u32 2147483647, %v2458_v59  ;;  %v874_v19 = vmul.f32 %v2535_v42, %v2471_v50 }
 0x121   : > { %v2551_v49 = vmul.f32 %v630_v53, %v566_v4  ;;  %v1340_v40 = vclamps-f32 %v344_v43, 40.0  ;;  %v797_v63 = vmul.f32 %v796_v54, %v2439_v20  ;;  %v860_v52 = vsub.f32 1.0, %v859_v3 }
 0x122   : > { %v1347_v13 = vclamps-f32 %v351_v60, 40.0  ;;  %v470_v32 = vmul.f32 1.442695, %v1346_v37  ;;  %v1161_v34 = vadd.f32 %v1160_v44, %v782_v7  ;;  %v981_v38 = vmul.f32 %v2496_v21, %v980_v39 }
 0x123   : > { %vm2555_vm11 = vcmp.eq.f32.partialorder %v987_v62, 8.507059e+37  ;;  %v995_v10 = vsub.f32 1.0, %v994_v55  ;;  %v1341_v28 = vclamps-f32 %v345_v25, 40.0  ;;  %v1182_v33 = vadd.f32 %v1181_v51, %v797_v63 }
 0x124   : > { %v2559_v12 = vor.u32 1.1754944e-38, %v1004_v18  ;;  %v2562_v8 = vmul.f32 3.203838, %v2374_v0  ;;  %v2564_v41 = vmul.f32 %v631_v46, %v567_v48  ;;  %vm984_vm12 = vweird.f32 %v2496_v21 }
 0x125   : > { %v875_v20 = vsub.f32 1.0, %v874_v19  ;;  %1557 = vrcp.f32 %v2551_v49  ;;  %v458_v44 = vmul.f32 1.442695, %v1340_v40  ;;  %v2569_v14 = vmul.f32 3.203838, %v2415_v23  ;;  %vm2580_vm13 = vmor %vm983_vm9, %vm984_vm12 }
 0x126   : > { %v861_v1 = vmul.f32 %v2512_v9, %v860_v52  ;;  %1559 = vpow2.f32 %v470_v32  ;;  %v472_v51 = vmul.f32 1.442695, %v1347_v13  ;;  %v1162_v0 = vadd.f32 %v1161_v34, %v2043_v57  ;;  %v261_v52 = vpop.permute.xlu2 %260 }
 0x127   : > { %v982_v17 = vadd.f32 %v2496_v21, %v981_v38  ;;  %v996_v11 = vmul.f32 %v2525_v30, %v995_v10  ;;  %v460_v62 = vmul.f32 1.442695, %v1341_v28  ;;  %v1183_v4 = vadd.f32 %v1182_v33, %v2046_v58 }
 0x128   : > { %vm999_vm14 = vweird.f32 %v2525_v30  ;;  %v867_v53 = vand.u32 2147483647, %v2454_v6  ;;  %1561 = vrcp.f32 %v2564_v41  ;;  %v869_v57 = vand.u32 2147483648, %v2454_v6 }
 0x129   : > { %v876_v43 = vmul.f32 %v2535_v42, %v875_v20  ;;  %1563 = vpow2.f32 %v458_v44  ;;  %v288_v58 = vsub.f32 %v2572_v31, %v1897_v26  ;;  %v862_v5 = vadd.f32 %v2512_v9, %v861_v1  ;;  %vm2609_vm0 = vmor %vm998_vm10, %vm999_vm14 }
 0x12a   : > { %vm864_vm15 = vweird.f32 %v2512_v9  ;;  %v882_v7 = vand.u32 2147483647, %v2471_v50  ;;  %1565 = vpow2.f32 %v472_v51  ;;  %v986_v60 = vsel %vm2580_vm13, %v2496_v21, %v982_v17 }
 0x12b   : > { %v2594_v3 = vpop.eup %1557  ;;  %v2600_v37 = vadd.f32 %v2525_v30, %v996_v11  ;;  %v884_v54 = vand.u32 2147483648, %v2471_v50  ;;  %1567 = vpow2.f32 %v460_v62  ;;  %vm863_vm1 = vweird.f32 %v2454_v6 }
 0x12c   : > { %v2603_v39 = vpop.eup %1559  ;;  %vm2614_vm2 = vcmp.eq.f32.partialorder %v867_v53, 8.507059e+37  ;;  %v2619_v25 = vadd.f32 %v1162_v0, %v2265_v16  ;;  %v2622_v18 = vadd.f32 %v1183_v4, %v2268_v35  ;;  %vm2624_vm3 = vmor %vm863_vm1, %vm864_vm15  ;;  %v877_v59 = vadd.f32 %v2535_v42, %v876_v43 }
 0x12d   : > { %vm878_vm4 = vweird.f32 %v2471_v50  ;;  %vm879_vm5 = vweird.f32 %v2535_v42  ;;  %v320_v6 = vsub.f32 0.0, %v288_v58  ;;  %v2636_v16 = vsel %vm2555_vm11, %v2544_v56, %v986_v60 }
 0x12e   : > { %v2631_v46 = vpop.eup %1561  ;;  %vm2638_vm6 = vcmp.eq.f32.partialorder %v1002_v29, 8.507059e+37  ;;  %v866_v19 = vsel %vm2624_vm3, %v2512_v9, %v862_v5  ;;  %v870_v40 = vor.u32 1.1754944e-38, %v869_v57  ;;  %v919_v63 = vmul.f32 %v2594_v3, %v2551_v49  ;;  %vm2664_vm8 = vmor %vm878_vm4, %vm879_vm5 }
 0x12f   : > { %v2647_v13 = vpop.eup %1563  ;;  %v1001_v56 = vsel %vm2609_vm0, %v2525_v30, %v2600_v37  ;;  %vm2653_vm7 = vcmp.eq.f32.partialorder %v882_v7, 8.507059e+37  ;;  %v885_v32 = vor.u32 1.1754944e-38, %v884_v54  ;;  %v542_v34 = vmul.f32 0.2865048, %v2603_v39 }
 0x130   : > { %v2658_v9 = vpop.eup %1565  ;;  %vm923_vm9 = vweird.f32 %v2551_v49  ;;  %v927_v30 = vand.u32 2147483647, %v2551_v49  ;;  %v606_v15 = vmul.f32 3.4903429, %v2603_v39  ;;  %v289_v10 = vsub.f32 %v2572_v31, %v1899_v27 }
 0x131   : > { %v2673_v28 = vpop.eup %1567  ;;  %v871_v33 = vsel %vm2614_vm2, %v870_v40, %v866_v19  ;;  %v881_v50 = vsel %vm2664_vm8, %v2535_v42, %v877_v59  ;;  %v352_v20 = vmul.f32 320.0, %v320_v6  ;;  %v292_v44 = vsub.f32 %v261_v52, %v1897_v26 }
 0x132   : > { %v920_v1 = vsub.f32 1.0, %v919_v63  ;;  %v934_v51 = vmul.f32 %v2631_v46, %v2564_v41  ;;  %v536_v0 = vmul.f32 0.2865048, %v2647_v13  ;;  %v600_v31 = vmul.f32 3.4903429, %v2647_v13 }
 0x133   : > { %v929_v17 = vand.u32 2147483648, %v2551_v49  ;;  %v543_v11 = vmul.f32 0.2865048, %v2658_v9  ;;  %v574_v62 = vadd.f32 1.0, %v542_v34  ;;  %v607_v4 = vmul.f32 3.4903429, %v2658_v9 }
 0x134   : > { %v638_v23 = vadd.f32 1.0, %v606_v15  ;;  %v537_v42 = vmul.f32 0.2865048, %v2673_v28  ;;  %v601_v53 = vmul.f32 3.4903429, %v2673_v28  ;;  %v321_v57 = vsub.f32 0.0, %v289_v10 }
 0x135   : > { %v872_v43 = vmul.f32 %v871_v33, %v2562_v8  ;;  %v886_v58 = vsel %vm2653_vm7, %v885_v32, %v881_v50  ;;  %v1348_v5 = vclamps-f32 %v352_v20, 40.0  ;;  %v324_v7 = vsub.f32 0.0, %v292_v44  ;;  %v237_v20 = vpop.permute.xlu1 %236 }
 0x136   : > { %v921_v60 = vmul.f32 %v2594_v3, %v920_v1  ;;  %v935_v37 = vsub.f32 1.0, %v934_v51  ;;  %v568_v54 = vadd.f32 1.0, %v536_v0  ;;  %v632_v55 = vadd.f32 1.0, %v600_v31 }
 0x137   : > { %vm924_vm10 = vweird.f32 %v2594_v3  ;;  %v575_v21 = vadd.f32 1.0, %v543_v11  ;;  %v639_v48 = vadd.f32 1.0, %v607_v4  ;;  %v293_v59 = vsub.f32 %v261_v52, %v1899_v27 }
 0x138   : > { %v2696_v6 = vmul.f32 %v638_v23, %v574_v62  ;;  %v569_v19 = vadd.f32 1.0, %v537_v42  ;;  %v633_v8 = vadd.f32 1.0, %v601_v53  ;;  %v353_v40 = vmul.f32 320.0, %v321_v57  ;;  %vm2715_vm12 = vmor %vm923_vm9, %vm924_vm10 }
 0x139   : > { %v1006_v63 = vsel %vm2638_vm6, %v2559_v12, %v1001_v56  ;;  %vm2701_vm11 = vcmp.eq.f32.partialorder %v927_v30, 8.507059e+37  ;;  %v474_v32 = vmul.f32 1.442695, %v1348_v5  ;;  %v356_v34 = vmul.f32 320.0, %v324_v7 }
 0x13a   : > { %v922_v38 = vadd.f32 %v2594_v3, %v921_v60  ;;  %v930_v15 = vor.u32 1.1754944e-38, %v929_v17  ;;  %v936_v52 = vmul.f32 %v2631_v46, %v935_v37  ;;  %v2707_v10 = vmul.f32 %v632_v55, %v568_v54 }
 0x13b   : > { %v887_v33 = vmul.f32 %v886_v58, %v2569_v14  ;;  %v1164_v50 = vadd.f32 %v2619_v25, %v872_v43  ;;  %v2719_v35 = vmul.f32 %v639_v48, %v575_v21  ;;  %v325_v56 = vsub.f32 0.0, %v293_v59 }
 0x13c   : > { %vm938_vm13 = vweird.f32 %v2564_v41  ;;  %1569 = vrcp.f32 %v2696_v6  ;;  %v2723_v30 = vmul.f32 %v633_v8, %v569_v19  ;;  %v1349_v14 = vclamps-f32 %v353_v40, 40.0 }
 0x13d   : > { %vm939_vm14 = vweird.f32 %v2631_v46  ;;  %v942_v25 = vand.u32 2147483647, %v2564_v41  ;;  %1571 = vpow2.f32 %v474_v32  ;;  %v1352_v49 = vclamps-f32 %v356_v34, 40.0  ;;  %v255_v29 = vpop.permute.xlu1 %254 }
 0x13e   : > { %v926_v44 = vsel %vm2715_vm12, %v2594_v3, %v922_v38  ;;  %v937_v1 = vadd.f32 %v2631_v46, %v936_v52  ;;  %v944_v51 = vand.u32 2147483648, %v2564_v41  ;;  %1573 = vrcp.f32 %v2707_v10  ;;  %vm2743_vm15 = vmor %vm938_vm13, %vm939_vm14 }
 0x13f   : > { %1575 = vrcp.f32 %v2719_v35  ;;  %v357_v0 = vmul.f32 320.0, %v325_v56  ;;  %v284_v31 = vsub.f32 %v237_v20, %v1897_v26  ;;  %v285_v17 = vsub.f32 %v237_v20, %v1899_v27 }
 0x140   : > { %v2738_v11 = vmul.f32 %v2636_v16, %v2493_v61  ;;  %v1185_v62 = vadd.f32 %v2622_v18, %v887_v33  ;;  %1577 = vrcp.f32 %v2723_v30  ;;  %v476_v4 = vmul.f32 1.442695, %v1349_v14 }
 0x141   : > { %v2749_v23 = vmul.f32 %v1006_v63, %v2510_v47  ;;  %v502_v42 = vmul.f32 3.203838, %v2476_v36  ;;  %v503_v53 = vmul.f32 3.203838, %v2504_v45  ;;  %v482_v61 = vmul.f32 1.442695, %v1352_v49 }
 0x142   : > { %v2753_v16 = vpop.eup %1569  ;;  %v931_v41 = vsel %vm2701_vm11, %v930_v15, %v926_v44  ;;  %vm2757_vm0 = vcmp.eq.f32.partialorder %v942_v25, 8.507059e+37  ;;  %v945_v57 = vor.u32 1.1754944e-38, %v944_v51  ;;  %v2762_v43 = vadd.f32 %v1164_v50, %v2399_v24 }
 0x143   : > { %v2764_v47 = vpop.eup %1571  ;;  %v941_v36 = vsel %vm2743_vm15, %v2631_v46, %v937_v1  ;;  %v1353_v45 = vclamps-f32 %v357_v0, 40.0  ;;  %v316_v58 = vsub.f32 0.0, %v284_v31  ;;  %v317_v5 = vsub.f32 0.0, %v285_v17 }
 0x144   : > { %v2769_v7 = vpop.eup %1573  ;;  %v2772_v60 = vadd.f32 %v1185_v62, %v2450_v22  ;;  %v2775_v37 = vmul.f32 3.203838, %v2603_v39  ;;  %v1049_v24 = vand.u32 2147483648, %v2696_v6  ;;  %1579 = vpow2.f32 %v476_v4 }
 0x145   : > { %v2778_v54 = vpop.eup %1575  ;;  %v2781_v55 = vmul.f32 3.203838, %v2658_v9  ;;  %v1039_v46 = vmul.f32 %v2753_v16, %v2696_v6  ;;  %v1064_v21 = vand.u32 2147483648, %v2719_v35  ;;  %1581 = vpow2.f32 %v482_v61 }
 0x146   : > { %v2786_v48 = vpop.eup %1577  ;;  %v2788_v22 = vmul.f32 %v931_v41, %v502_v42  ;;  %v946_v39 = vsel %vm2757_vm0, %v945_v57, %v941_v36  ;;  %v544_v59 = vmul.f32 0.2865048, %v2764_v47  ;;  %v608_v19 = vmul.f32 3.4903429, %v2764_v47 }
 0x147   : > { %v949_v9 = vmul.f32 %v2769_v7, %v2707_v10  ;;  %v484_v8 = vmul.f32 1.442695, %v1353_v45  ;;  %v348_v40 = vmul.f32 320.0, %v316_v58  ;;  %v349_v63 = vmul.f32 320.0, %v317_v5 }
 0x148   : > { %v1047_v32 = vand.u32 2147483647, %v2696_v6  ;;  %v2797_v34 = vor.u32 1.1754944e-38, %v1049_v24  ;;  %v1054_v38 = vmul.f32 %v2778_v54, %v2719_v35  ;;  %v2802_v15 = vmul.f32 3.203838, %v2647_v13 }
 0x149   : > { %v1040_v52 = vsub.f32 1.0, %v1039_v46  ;;  %vm1043_vm1 = vweird.f32 %v2696_v6  ;;  %v1062_v33 = vand.u32 2147483647, %v2719_v35  ;;  %v2806_v50 = vor.u32 1.1754944e-38, %v1064_v21 }
 0x14a   : > { %v964_v12 = vmul.f32 %v2786_v48, %v2723_v30  ;;  %v2810_v56 = vpop.eup %1579  ;;  %v2812_v14 = vmul.f32 %v946_v39, %v503_v53  ;;  %vm1058_vm2 = vweird.f32 %v2719_v35  ;;  %v576_v20 = vadd.f32 1.0, %v544_v59 }
 0x14b   : > { %v640_v25 = vadd.f32 1.0, %v608_v19  ;;  %v290_v13 = vsub.f32 %v255_v29, %v1897_v26  ;;  %v2816_v49 = vpop.eup %1581  ;;  %v950_v44 = vsub.f32 1.0, %v949_v9  ;;  %1583 = vpow2.f32 %v484_v8 }
 0x14c   : > { %v1344_v1 = vclamps-f32 %v348_v40, 40.0  ;;  %v1345_v51 = vclamps-f32 %v349_v63, 40.0  ;;  %vm1044_vm3 = vweird.f32 %v2753_v16  ;;  %v1055_v0 = vsub.f32 1.0, %v1054_v38 }
 0x14d   : > { %vm1059_vm4 = vweird.f32 %v2778_v54  ;;  %v957_v31 = vand.u32 2147483647, %v2707_v10  ;;  %v1041_v17 = vmul.f32 %v2753_v16, %v1040_v52  ;;  %vm953_vm5 = vweird.f32 %v2707_v10  ;;  %vm2854_vm10 = vmor %vm1043_vm1, %vm1044_vm3 }
 0x14e   : > { %v965_v62 = vsub.f32 1.0, %v964_v12  ;;  %v545_v26 = vmul.f32 0.2865048, %v2810_v56  ;;  %v609_v3 = vmul.f32 3.4903429, %v2810_v56  ;;  %v2825_v4 = vmul.f32 %v640_v25, %v576_v20  ;;  %vm2866_vm11 = vmor %vm1058_vm2, %vm1059_vm4 }
 0x14f   : > { %v548_v42 = vmul.f32 0.2865048, %v2816_v49  ;;  %v612_v53 = vmul.f32 3.4903429, %v2816_v49  ;;  %v466_v61 = vmul.f32 1.442695, %v1344_v1  ;;  %v951_v41 = vmul.f32 %v2769_v7, %v950_v44 }
 0x150   : > { %v468_v18 = vmul.f32 1.442695, %v1345_v51  ;;  %v291_v57 = vsub.f32 %v255_v29, %v1899_v27  ;;  %v322_v36 = vsub.f32 0.0, %v290_v13  ;;  %v1056_v45 = vmul.f32 %v2778_v54, %v1055_v0 }
 0x151   : > { %v959_v58 = vand.u32 2147483648, %v2707_v10  ;;  %vm968_vm6 = vweird.f32 %v2723_v30  ;;  %1585 = vpow2.f32 %v466_v61  ;;  %v2834_v5 = vpop.eup %1583  ;;  %vm2836_vm7 = vcmp.eq.f32.partialorder %v1047_v32, 8.507059e+37 }
 0x152   : > { %vm954_vm8 = vweird.f32 %v2769_v7  ;;  %v972_v46 = vand.u32 2147483647, %v2723_v30  ;;  %v577_v21 = vadd.f32 1.0, %v545_v26  ;;  %v641_v27 = vadd.f32 1.0, %v609_v3 }
 0x153   : > { %vm2842_vm9 = vcmp.eq.f32.partialorder %v1062_v33, 8.507059e+37  ;;  %v966_v59 = vmul.f32 %v2786_v48, %v965_v62  ;;  %1587 = vrcp.f32 %v2825_v4  ;;  %v580_v19 = vadd.f32 1.0, %v548_v42  ;;  %vm2882_vm13 = vmor %vm953_vm5, %vm954_vm8 }
 0x154   : > { %v644_v9 = vadd.f32 1.0, %v612_v53  ;;  %v952_v8 = vadd.f32 %v2769_v7, %v951_v41  ;;  %1589 = vpow2.f32 %v468_v18  ;;  %v323_v40 = vsub.f32 0.0, %v291_v57 }
 0x155   : > { %v354_v63 = vmul.f32 320.0, %v322_v36  ;;  %v1042_v29 = vadd.f32 %v2753_v16, %v1041_v17  ;;  %v974_v38 = vand.u32 2147483648, %v2723_v30  ;;  %v549_v52 = vmul.f32 0.2865048, %v2834_v5 }
 0x156   : > { %v613_v33 = vmul.f32 3.4903429, %v2834_v5  ;;  %v1057_v12 = vadd.f32 %v2778_v54, %v1056_v45  ;;  %vm2870_vm12 = vcmp.eq.f32.partialorder %v957_v31, 8.507059e+37  ;;  %v960_v25 = vor.u32 1.1754944e-38, %v959_v58 }
 0x157   : > { %v2874_v13 = vmul.f32 %v641_v27, %v577_v21  ;;  %v2876_v44 = vpop.eup %1585  ;;  %v967_v35 = vadd.f32 %v2786_v48, %v966_v59  ;;  %vm969_vm14 = vweird.f32 %v2786_v48  ;;  %vm2888_vm15 = vcmp.eq.f32.partialorder %v972_v46, 8.507059e+37 }
 0x158   : > { %v2892_v0 = vmul.f32 %v644_v9, %v580_v19  ;;  %v956_v31 = vsel %vm2882_vm13, %v2769_v7, %v952_v8  ;;  %v540_v10 = vmul.f32 0.2865048, %v2876_v44  ;;  %v355_v17 = vmul.f32 320.0, %v323_v40  ;;  %vm2910_vm0 = vmor %vm968_vm6, %vm969_vm14 }
 0x159   : > { %v1350_v62 = vclamps-f32 %v354_v63, 40.0  ;;  %v2898_v26 = vpop.eup %1587  ;;  %v1046_v3 = vsel %vm2854_vm10, %v2753_v16, %v1042_v29  ;;  %v975_v42 = vor.u32 1.1754944e-38, %v974_v38  ;;  %v581_v53 = vadd.f32 1.0, %v549_v52 }
 0x15a   : > { %v645_v61 = vadd.f32 1.0, %v613_v33  ;;  %v2903_v41 = vpop.eup %1589  ;;  %v1061_v18 = vsel %vm2866_vm11, %v2778_v54, %v1057_v12  ;;  %1591 = vrcp.f32 %v2874_v13  ;;  %v572_v57 = vadd.f32 1.0, %v540_v10 }
 0x15b   : > { %v604_v16 = vmul.f32 3.4903429, %v2876_v44  ;;  %v961_v36 = vsel %vm2870_vm12, %v960_v25, %v956_v31  ;;  %v971_v45 = vsel %vm2910_vm0, %v2786_v48, %v967_v35  ;;  %1593 = vrcp.f32 %v2892_v0 }
 0x15c   : > { %v541_v30 = vmul.f32 0.2865048, %v2903_v41  ;;  %v605_v54 = vmul.f32 3.4903429, %v2903_v41  ;;  %v1351_v46 = vclamps-f32 %v355_v17, 40.0  ;;  %v1051_v27 = vsel %vm2836_vm7, %v2797_v34, %v1046_v3 }
 0x15d   : > { %v636_v58 = vadd.f32 1.0, %v604_v16  ;;  %v478_v21 = vmul.f32 1.442695, %v1350_v62  ;;  %v1069_v59 = vmul.f32 %v2898_v26, %v2825_v4  ;;  %v2929_v19 = vmul.f32 %v645_v61, %v581_v53 }
 0x15e   : > { %v573_v9 = vadd.f32 1.0, %v541_v30  ;;  %v1066_v48 = vsel %vm2842_vm9, %v2806_v50, %v1061_v18  ;;  %v637_v8 = vadd.f32 1.0, %v605_v54  ;;  %v1166_v63 = vadd.f32 %v2762_v43, %v2788_v22 }
 0x15f   : > { %v2934_v40 = vmul.f32 %v636_v58, %v572_v57  ;;  %1595 = vpow2.f32 %v478_v21  ;;  %v505_v24 = vmul.f32 3.203838, %v2673_v28  ;;  %v962_v34 = vmul.f32 %v961_v36, %v2802_v15 }
 0x160   : > { %v976_v29 = vsel %vm2888_vm15, %v975_v42, %v971_v45  ;;  %v2942_v32 = vpop.eup %1591  ;;  %v1187_v39 = vadd.f32 %v2772_v60, %v2812_v14  ;;  %v2946_v50 = vmul.f32 %v637_v8, %v573_v9  ;;  %v480_v38 = vmul.f32 1.442695, %v1351_v46 }
 0x161   : > { %1597 = vrcp.f32 %v2934_v40  ;;  %v2949_v52 = vpop.eup %1593  ;;  %v2952_v43 = vmul.f32 %v1051_v27, %v2775_v37  ;;  %v2955_v28 = vmul.f32 %v1066_v48, %v2781_v55  ;;  %v1070_v22 = vsub.f32 1.0, %v1069_v59 }
 0x162   : > { %1599 = vrcp.f32 %v2929_v19  ;;  %v977_v15 = vmul.f32 %v976_v29, %v505_v24  ;;  %v1079_v33 = vand.u32 2147483648, %v2825_v4  ;;  %v1094_v60 = vand.u32 2147483648, %v2874_v13 }
 0x163   : > { %1601 = vrcp.f32 %v2946_v50  ;;  %v1167_v14 = vadd.f32 %v1166_v63, %v962_v34  ;;  %v2962_v12 = vmul.f32 3.203838, %v2764_v47  ;;  %v2965_v37 = vmul.f32 3.203838, %v2810_v56 }
 0x164   : > { %v2968_v55 = vmul.f32 3.203838, %v2816_v49  ;;  %vm1073_vm1 = vweird.f32 %v2825_v4  ;;  %v1084_v6 = vmul.f32 %v2942_v32, %v2874_v13  ;;  %v1129_v25 = vmul.f32 %v2949_v52, %v2892_v0 }
 0x165   : > { %v2970_v20 = vpop.eup %1595  ;;  %1603 = vpow2.f32 %v480_v38  ;;  %v1071_v47 = vmul.f32 %v2898_v26, %v1070_v22  ;;  %v1077_v1 = vand.u32 2147483647, %v2825_v4  ;;  %v1092_v56 = vand.u32 2147483647, %v2874_v13 }
 0x166   : > { %v546_v49 = vmul.f32 0.2865048, %v2970_v20  ;;  %v2981_v51 = vadd.f32 %v1187_v39, %v977_v15  ;;  %v2983_v31 = vor.u32 1.1754944e-38, %v1079_v33  ;;  %v2985_v10 = vor.u32 1.1754944e-38, %v1094_v60 }
 0x167   : > { %v1598_v35 = vpop.eup %1597  ;;  %v610_v17 = vmul.f32 3.4903429, %v2970_v20  ;;  %vm1074_vm2 = vweird.f32 %v2898_v26  ;;  %v2993_v42 = vadd.f32 %v1167_v14, %v2738_v11  ;;  %v1085_v18 = vsub.f32 1.0, %v1084_v6 }
 0x168   : > { %v2988_v62 = vpop.eup %1599  ;;  %v1009_v3 = vmul.f32 %v1598_v35, %v2934_v40  ;;  %v578_v53 = vadd.f32 1.0, %v546_v49  ;;  %v1130_v7 = vsub.f32 1.0, %v1129_v25  ;;  %vm1133_vm3 = vweird.f32 %v2892_v0  ;;  %vm3026_vm9 = vmor %vm1073_vm1, %vm1074_vm2 }
 0x169   : > { %v2995_v61 = vpop.eup %1601  ;;  %v1137_v57 = vand.u32 2147483647, %v2892_v0  ;;  %v642_v16 = vadd.f32 1.0, %v610_v17  ;;  %v1072_v36 = vadd.f32 %v2898_v26, %v1071_v47  ;;  %v508_v45 = vmul.f32 3.203838, %v2876_v44 }
 0x16a   : > { %v1010_v30 = vsub.f32 1.0, %v1009_v3  ;;  %v1024_v54 = vmul.f32 %v2995_v61, %v2946_v50  ;;  %vm3005_vm4 = vcmp.eq.f32.partialorder %v1077_v1, 8.507059e+37  ;;  %vm1088_vm5 = vweird.f32 %v2874_v13 }
 0x16b   : > { %v3003_v11 = vpop.eup %1603  ;;  %vm1089_vm6 = vweird.f32 %v2942_v32  ;;  %v1144_v46 = vmul.f32 %v2988_v62, %v2929_v19  ;;  %v1017_v21 = vand.u32 2147483647, %v2934_v40  ;;  %v1019_v44 = vand.u32 2147483648, %v2934_v40 }
 0x16c   : > { %v3015_v27 = vmul.f32 %v642_v16, %v578_v53  ;;  %v1011_v59 = vmul.f32 %v1598_v35, %v1010_v30  ;;  %vm1014_vm7 = vweird.f32 %v1598_v35  ;;  %v1025_v9 = vsub.f32 1.0, %v1024_v54 }
 0x16d   : > { %v547_v48 = vmul.f32 0.2865048, %v3003_v11  ;;  %v1131_v8 = vmul.f32 %v2949_v52, %v1130_v7  ;;  %vm1013_vm8 = vweird.f32 %v2934_v40  ;;  %v611_v63 = vmul.f32 3.4903429, %v3003_v11 }
 0x16e   : > { %1605 = vrcp.f32 %v3015_v27  ;;  %v1012_v34 = vadd.f32 %v1598_v35, %v1011_v59  ;;  %v1026_v29 = vmul.f32 %v2995_v61, %v1025_v9  ;;  %vm1029_vm10 = vweird.f32 %v2995_v61  ;;  %vm1015_vm11 = vmor %vm1013_vm8, %vm1014_vm7 }
 0x16f   : > { %v579_v39 = vadd.f32 1.0, %v547_v48  ;;  %v1020_v40 = vor.u32 1.1754944e-38, %v1019_v44  ;;  %vm1028_vm12 = vweird.f32 %v2946_v50  ;;  %v1034_v38 = vand.u32 2147483648, %v2946_v50 }
 0x170   : > { %v643_v22 = vadd.f32 1.0, %v611_v63  ;;  %v1016_v15 = vsel %vm1015_vm11, %v1598_v35, %v1012_v34  ;;  %vm1018_vm13 = vcmp.eq.f32.partialorder %v1017_v21, 8.507059e+37  ;;  %v1027_v4 = vadd.f32 %v2995_v61, %v1026_v29  ;;  %vm3038_vm15 = vmor %vm1028_vm12, %vm1029_vm10 }
 0x171   : > { %v1032_v33 = vand.u32 2147483647, %v2946_v50  ;;  %v1086_v60 = vmul.f32 %v2942_v32, %v1085_v18  ;;  %vm1134_vm14 = vweird.f32 %v2949_v52  ;;  %v1021_v14 = vsel %vm1018_vm13, %v1020_v40, %v1016_v15 }
 0x172   : > { %v3042_v25 = vmul.f32 %v643_v22, %v579_v39  ;;  %v1076_v47 = vsel %vm3026_vm9, %v2898_v26, %v1072_v36  ;;  %vm3047_vm0 = vcmp.eq.f32.partialorder %v1092_v56, 8.507059e+37  ;;  %v1139_v50 = vand.u32 2147483648, %v2892_v0  ;;  %vm3059_vm1 = vmor %vm1133_vm3, %vm1134_vm14 }
 0x173   : > { %v1022_v49 = vmul.f32 %v1021_v14, %v508_v45  ;;  %v1031_v35 = vsel %vm3038_vm15, %v2995_v61, %v1027_v4  ;;  %v1132_v3 = vadd.f32 %v2949_v52, %v1131_v8  ;;  %v1145_v53 = vsub.f32 1.0, %v1144_v46  ;;  %vm3080_vm3 = vmor %vm1088_vm5, %vm1089_vm6 }
 0x174   : > { %v1606_v17 = vpop.eup %1605  ;;  %v1035_v18 = vor.u32 1.1754944e-38, %v1034_v38  ;;  %1607 = vrcp.f32 %v3042_v25  ;;  %vm1148_vm2 = vweird.f32 %v2929_v19  ;;  %vm1033_vm7 = vcmp.eq.f32.partialorder %v1032_v33, 8.507059e+37 }
 0x175   : > { %v1189_v56 = vadd.f32 %v2981_v51, %v2749_v23  ;;  %v1099_v61 = vmul.f32 %v1606_v17, %v3015_v27  ;;  %v1087_v7 = vadd.f32 %v2942_v32, %v1086_v60  ;;  %vm3068_vm8 = vcmp.eq.f32.partialorder %v1137_v57, 8.507059e+37  ;;  %v1158_v23 = vld [vmem:[%s1891_s17] sm:$0x3] }
 0x176   : > { %v1152_v0 = vand.u32 2147483647, %v2929_v19  ;;  %v1036_v36 = vsel %vm1033_vm7, %v1035_v18, %v1031_v35  ;;  %v1081_v45 = vsel %vm3005_vm4, %v2983_v31, %v1076_v47  ;;  %v509_v51 = vmul.f32 3.203838, %v2903_v41 }
 0x177   : > { %v1169_v57 = vadd.f32 %v2993_v42, %v1022_v49  ;;  %v1100_v30 = vsub.f32 1.0, %v1099_v61  ;;  %v1136_v54 = vsel %vm3059_vm1, %v2949_v52, %v1132_v3  ;;  %v1140_v46 = vor.u32 1.1754944e-38, %v1139_v50 }
 0x178   : > { %v1146_v31 = vmul.f32 %v2988_v62, %v1145_v53  ;;  %v1109_v58 = vand.u32 2147483648, %v3015_v27  ;;  %v1037_v21 = vmul.f32 %v1036_v36, %v509_v51  ;;  %vm1104_vm4 = vweird.f32 %v1606_v17 }
 0x179   : > { %v1101_v13 = vmul.f32 %v1606_v17, %v1100_v30  ;;  %v1107_v44 = vand.u32 2147483647, %v3015_v27  ;;  %v1082_v41 = vmul.f32 %v1081_v45, %v2962_v12  ;;  %v1091_v42 = vsel %vm3080_vm3, %v2942_v32, %v1087_v7 }
 0x17a   : > { %v1608_v59 = vpop.eup %1607  ;;  %vm1149_vm5 = vweird.f32 %v2988_v62  ;;  %v1154_v52 = vand.u32 2147483648, %v2929_v19  ;;  %v1170_v9 = vadd.f32 %v1169_v57, %v2952_v43  ;;  %vm1103_vm6 = vweird.f32 %v3015_v27 }
 0x17b   : > { %v1102_v48 = vadd.f32 %v1606_v17, %v1101_v13  ;;  %v1114_v8 = vmul.f32 %v1608_v59, %v3042_v25  ;;  %v1141_v63 = vsel %vm3068_vm8, %v1140_v46, %v1136_v54  ;;  %v1147_v12 = vadd.f32 %v2988_v62, %v1146_v31  ;;  %vm1105_vm9 = vmor %vm1103_vm6, %vm1104_vm4 }
 0x17c   : > { %v514_v24 = vmul.f32 3.203838, %v2970_v20  ;;  %v1110_v32 = vor.u32 1.1754944e-38, %v1109_v58  ;;  %vm3107_vm10 = vmor %vm1148_vm2, %vm1149_vm5  ;;  %v1190_v43 = vadd.f32 %v1189_v56, %v1037_v21  ;;  %vm1108_vm11 = vcmp.eq.f32.partialorder %v1107_v44, 8.507059e+37 }
 0x17d   : > { %v1106_v29 = vsel %vm1105_vm9, %v1606_v17, %v1102_v48  ;;  %v1115_v27 = vsub.f32 1.0, %v1114_v8  ;;  %v1096_v39 = vsel %vm3047_vm0, %v2985_v10, %v1091_v42  ;;  %v1122_v38 = vand.u32 2147483647, %v3042_v25 }
 0x17e   : > { %v1111_v40 = vsel %vm1108_vm11, %v1110_v32, %v1106_v29  ;;  %v1124_v20 = vand.u32 2147483648, %v3042_v25  ;;  %vm1119_vm12 = vweird.f32 %v1608_v59  ;;  %v1171_v19 = vadd.f32 %v1170_v9, %v1082_v41 }
 0x17f   : > { %v1112_v22 = vmul.f32 %v1111_v40, %v514_v24  ;;  %v1116_v15 = vmul.f32 %v1608_v59, %v1115_v27  ;;  %v1142_v4 = vmul.f32 %v1141_v63, %v2968_v55  ;;  %v1151_v33 = vsel %vm3107_vm10, %v2988_v62, %v1147_v12 }
 0x180   : > { %vm1153_vm13 = vcmp.eq.f32.partialorder %v1152_v0, 8.507059e+37  ;;  %v1155_v60 = vor.u32 1.1754944e-38, %v1154_v52  ;;  %v1191_v14 = vadd.f32 %v1190_v43, %v2955_v28  ;;  %vm1118_vm14 = vweird.f32 %v3042_v25 }
 0x181   : > { %v1117_v10 = vadd.f32 %v1608_v59, %v1116_v15  ;;  %v1172_v6 = vadd.f32 %v1171_v19, %v1112_v22  ;;  %v1097_v47 = vmul.f32 %v1096_v39, %v2965_v37  ;;  %v517_v1 = vmul.f32 3.203838, %v2834_v5  ;;  %vm1120_vm15 = vmor %vm1118_vm14, %vm1119_vm12 }
 0x182   : > { %v1125_v50 = vor.u32 1.1754944e-38, %v1124_v20  ;;  %v515_v55 = vmul.f32 3.203838, %v3003_v11  ;;  %vm1123_vm0 = vcmp.eq.f32.partialorder %v1122_v38, 8.507059e+37  ;;  %v1156_v62 = vsel %vm1153_vm13, %v1155_v60, %v1151_v33 }
 0x183   : > { %v1121_v49 = vsel %vm1120_vm15, %v1608_v59, %v1117_v10  ;;  %v1173_v35 = vadd.f32 %v1172_v6, %v1142_v4  ;;  %v1192_v28 = vadd.f32 %v1191_v14, %v1097_v47  ;;  %v1157_v18 = vmul.f32 %v1156_v62, %v517_v1 }
 0x184   : > { %v1126_v17 = vsel %vm1123_vm0, %v1125_v50, %v1121_v49  ;;  %vm1204_vm1 = vcmask 1040384   ;;  %vm1210_vm2 = vcmp.lt.s32.totalorder %v155_v2, 256 }
 0x185   : > { %v1127_v3 = vmul.f32 %v1126_v17, %v515_v55  ;;  %v1174_v53 = vrot.slane %v1173_v35, 4 }
 0x187   : > { %v1175_v25 = vadd.f32 %v1174_v53, %v1173_v35  ;;  %v1193_v26 = vadd.f32 %v1192_v28, %v1127_v3 }
 0x189   : > { %v1194_v56 = vadd.f32 %v1193_v26, %v1157_v18  ;;  %v1176_v37 = vrot.slane %v1175_v25, 2 }
 0x18b   : > { %v1195_v5 = vrot.slane %v1194_v56, 4  ;;  %v1177_v7 = vadd.f32 %v1176_v37, %v1175_v25 }
 0x18d   : > { %v1196_v61 = vadd.f32 %v1195_v5, %v1194_v56  ;;  %v1178_v0 = vrot.slane %v1177_v7, 1 }
 0x18f   : > { %v1197_v16 = vrot.slane %v1196_v61, 2  ;;  %v1179_v51 = vadd.f32 %v1178_v0, %v1177_v7 }
 0x191   : > { %v1198_v11 = vadd.f32 %v1197_v16, %v1196_v61 }
 0x193   : > { %v1199_v36 = vrot.slane %v1198_v11, 1 }
 0x195   : > { %v1200_v45 = vadd.f32 %v1199_v36, %v1198_v11 }
 0x197   : > { %v1203_v57 = vrot.slane %v1200_v45, 7 }
 0x198   : > { %1216 = sbr.rel (%p1354_p7) target bundleno = 423 (0x1a7), region = 36 }
 0x199   : > { %v1205_v30 = vsel %vm1204_vm1, %v1179_v51, %v1203_v57 }
 0x19a   : > { %v1207_v54 = vadd.f32 %v1205_v30, %v1158_v23 }
 0x19c   : > { %1212 = vst.msk [vmem:[%s1891_s17] sm:$0x3] %vm1210_vm2, %v1207_v54 }
 0x1a3   : > { %v1217_v46 = vld [vmem:[%s1891_s17] sm:$0x3] }
 0x1a4   : > { %v1218_v31 = vmul.f32 0.003125, %v1217_v46 }
 0x1a6   : > { %1219 = vst.msk [vmem:[%s1891_s17] sm:$0x3] %vm1210_vm2, %v1218_v31 }
 0x1a7 PF: > { %s1356_s20 = sshll.u32 %s1749_s13, 1  ;;  %s1233_s22 = sshll.u32 %s1891_s17, 4  ;;  %s1234_s22 = int_to_ptr.vmem [resolvable:$true] %s1233_s22 }
 0x1a8   : > { %s1231_s9 = scalar_lea.hbm %s3186_s1, %s1356_s20  ;;  %s1221_s12 = scalar_lea.sflag [#allocation4], %s143_s23 }
 0x1a9   : > { %s1235_s24 = sshll.u32 %s1231_s9, 4  ;;  %s1659_s13 = scalar_lea.hbm %s3186_s1, 4  ;;  %s1236_s24 = int_to_ptr.hbm [resolvable:$true] %s1235_s24 }
 0x1aa   : > { %s1653_s21 = sshra.s32 %s1236_s24, 4  ;;  %s1654_s21 = int_to_ptr.hbm [resolvable:$true] %s1653_s21 }
 0x1ab   : > { %s1655_s26 = scalar_lea.hbm %s1654_s21, 2  ;;  %p1660_p13 = scmp.lt.s32.totalorder %s1654_s21, %s3186_s1 }
 0x1ac   : > { %p1656_p9 = scmp.ne.s32.totalorder %s1654_s21, %s1655_s26  ;;  %p1661_p0 = scmp.lt.s32.totalorder %s1659_s13, %s1655_s26 }
 0x1ae   : > { %p1657_p10 = pnand %p1656_p9, %p1856_p12  ;;  %p1662_p1 = por %p1661_p0, %p1660_p13 }
 0x1b0   : > { %p1658_p11 = pneg %p1657_p10 }
 0x1b2   : > { %p1663_p4 = pnand %p1662_p1, %p1658_p11 }
 0x1b4   : > { %1666 = shalt.err (!%p1663_p4)
}
 0x1b5   : > { %1362 = dma.vmem_to_hbm [thread:$0]  (%p1856_p12), %s1234_s22, 32, %s1236_s24, %s1221_s12  }
 0x1b6 PF: > { %p1373_p5 = scmp.ge.s32.totalorder %s1761_s16, 2  ;;  %s1247_s23 = sand.u32 1, %s1721_s6  }
 0x1b7   : > { %s1248_s17 = scalar_lea.sflag [#allocation4], %s1247_s23 }
 0x1b8   : > { %p1369_p6 = pnand %p1373_p5, %p1869_p2 }
 0x1ba   : > { %p1370_p8 = pneg %p1369_p6 }
 0x1bc   : > { %1716 = dma.done.wait (%p1370_p8), %s1248_s17, 32  }
 0x1bd   : > { %1718 = vsyncadd (%p1370_p8), %s1248_s17, 4294967264  ;;  %s17_s16 = sadd.s32 1, %s1761_s16   ;;  %s3305_s28 = sld [smem:[#allocation8_spill]] }
 0x1be   : > { %p14_p3 = scmp.ge.s32.totalorder %s17_s16, 8   ;;  %s3306_s6 = smov %s1725_s7 }
 0x1bf   : > { %s3307_s7 = smov %s1729_s8  ;;  %s3308_s8 = smov %s1861_s29 }
 0x1c0   : > { %s3309_s9 = smov %s1737_s10  ;;  %s3310_s10 = smov %s1741_s11 }
 0x1c1   : > { %s3311_s11 = smov %s1864_s30  ;;  %s3312_s12 = smov %s1753_s14 }
 0x1c2   : > { %s3313_s13 = smov %s1757_s15  ;;  %s3314_s14 = smov %s3317_s19 }
 0x1c3   : > { %s3315_s15 = smov %s3305_s28  ;;  %16 = sbr.rel (!%p14_p3) target bundleno = 9 (0x9), region = 77 }
 0x1c8   :  { %1254 = vsyncpa [#allocation3], 1 }
 0x1c9   :  { %1256 = vsyncpa [#allocation3 + $0x1], 1 }
 0x1ca   :  { %1257 = vsyncpa [#allocation4], 1 }
 0x1cb   :  { %1259 = vsyncpa [#allocation4 + $0x1], 1 }

</bundles_post_ra>
